<compile_context>
chip_gen: v5e
topology: v5e:2x2
jax: 0.10.0
libtpu: 0.0.40
codegen_flags: <defaults>
</compile_context>

<pallas_src>
import functools

import jax
import jax.numpy as jnp
from jax.experimental import pallas as pl
from jax.experimental.pallas import tpu as pltpu


# ---------------------------------------------------------------------------
# Fused per-layer kernel (transposed, lane-dense):
#   GEMM(+bias) -> BN stats -> normalize + affine -> SiLU
# Single grid step; every operand is a full-array block resident in VMEM.
#   prm:       (C_out, 3)  columns = [bias, gamma, beta]          (f32)
#   patches_t: (K, M)      K = ks*ks*C_in (sublanes), M = N*Ho*Wo (lanes)
#   w_t:       (C_out, K)
#   out:       (C_out, M)  f32
# ---------------------------------------------------------------------------
def _fused_conv_bn_silu(patches_t, w_t, prm, eps=1e-5):
    k, m = patches_t.shape
    c_out = w_t.shape[0]
    inv_m = 1.0 / float(m)

    def kernel(p_ref, x_ref, w_ref, o_ref):
        # Conv as GEMM; f32 accumulation on the MXU (inputs may be f32 or bf16).
        y = jnp.dot(w_ref[...], x_ref[...], preferred_element_type=jnp.float32)
        y = y + p_ref[:, 0:1]                                   # + bias, (C_out, M)

        # BatchNorm2d training-mode statistics over all M = N*Ho*Wo samples
        # (lane reduction -> XLU; channels sit on sublanes, no masking needed).
        mean = jnp.sum(y, axis=1, keepdims=True) * inv_m        # (C_out, 1)
        var = jnp.sum(y * y, axis=1, keepdims=True) * inv_m - mean * mean
        var = jnp.maximum(var, 0.0)          # guard E[y^2]-mean^2 cancellation -> no NaN
        inv_std = jax.lax.rsqrt(var + eps)                      # EUP rsqrt

        # Folded BN affine + SiLU; lane-dense store.
        scale = p_ref[:, 1:2] * inv_std
        shift = p_ref[:, 2:3] - mean * scale
        z = y * scale + shift
        o_ref[...] = z * jax.nn.sigmoid(z)

    return pl.pallas_call(
        kernel,
        out_shape=jax.ShapeDtypeStruct((c_out, m), jnp.float32),
        grid=(1,),
        in_specs=[
            pl.BlockSpec((c_out, 3), lambda i: (0, 0)),
            pl.BlockSpec((k, m), lambda i: (0, 0)),
            pl.BlockSpec((c_out, k), lambda i: (0, 0)),
        ],
        out_specs=pl.BlockSpec((c_out, m), lambda i: (0, 0)),
        compiler_params=pltpu.CompilerParams(
            dimension_semantics=("arbitrary",)),
    )(prm, patches_t, w_t)


# ---------------------------------------------------------------------------
# im2col from channels-first (C, N, H, W) -> transposed patches (K, M)
# (plain JAX glue on tiny arrays; see TODO about moving it in-kernel)
# ---------------------------------------------------------------------------
def _im2col_cnhw(x_cnhw, ks, stride, padding):
    c, n, h, w = x_cnhw.shape
    ho = (h - ks + 2 * padding) // stride + 1
    wo = (w - ks + 2 * padding) // stride + 1
    xp = jnp.pad(x_cnhw, ((0, 0), (0, 0), (padding, padding), (padding, padding)))
    cols = []
    for kh in range(ks):
        for kw in range(ks):
            cols.append(xp[:, :, kh:kh + stride * ho:stride,
                               kw:kw + stride * wo:stride])
    # (ks*ks, C, N, Ho, Wo) -> (K, M); K order = (kh, kw, ci), M order = (n, ho, wo)
    patches_t = jnp.stack(cols, axis=0).reshape(ks * ks * c, n * ho * wo)
    return patches_t, ho, wo


# ---------------------------------------------------------------------------
# One backbone block: Conv2d -> BatchNorm2d(training) -> SiLU  (one pallas_call)
# ---------------------------------------------------------------------------
def conv_bn_silu_layer(act, spatial, w, b, gamma, beta, stride, padding,
                       eps=1e-5, compute_dtype=jnp.float32):
    # act: (C_in, N*H*W) channels-first activation (channels on sublanes, rows on lanes)
    n, h, wd = spatial
    c_in = act.shape[0]
    c_out, _, ks, _ = w.shape

    x = act.reshape(c_in, n, h, wd)
    patches_t, ho, wo = _im2col_cnhw(x, ks, stride, padding)

    # weight rows = C_out, columns ordered (kh, kw, ci) to match patches_t.
    w_t = w.transpose(0, 2, 3, 1).reshape(c_out, ks * ks * c_in)
    prm = jnp.stack([b, gamma, beta], axis=1)                   # (C_out, 3) f32

    out = _fused_conv_bn_silu(patches_t.astype(compute_dtype),
                              w_t.astype(compute_dtype), prm, eps)
    return out, (n, ho, wo)


def encoder_forward(x, params, padding, strides, compute_dtype=jnp.float32):
    # x: (B, L, C, H, W)  ->  (B, L, C_last*H_last*W_last)
    b, l = x.shape[0], x.shape[1]
    n = b * l
    # (B,L,C,H,W) -> channels-first (C, N, H, W) once at the API boundary.
    y = x.reshape((n,) + x.shape[2:]).transpose(1, 0, 2, 3)
    spatial = (n, y.shape[2], y.shape[3])
    act = y.reshape(y.shape[0], n * y.shape[2] * y.shape[3])

    for p, stride in zip(params, strides):
        act, spatial = conv_bn_silu_layer(act, spatial, p["w"], p["b"],
                                          p["gamma"], p["beta"], stride, padding,
                                          compute_dtype=compute_dtype)

    n_, ho, wo = spatial
    c_last = act.shape[0]
    # (C, N, Ho, Wo) -> (N, C, Ho, Wo) -> (B, L, C*Ho*Wo), matching PyTorch flatten order.
    out = act.reshape(c_last, n_, ho, wo).transpose(1, 0, 2, 3)
    return out.reshape(b, l, -1)


# ---------------------------------------------------------------------------
# Pure-JAX reference (for correctness check only)
# ---------------------------------------------------------------------------
def ref_forward(x, params, padding, strides, eps=1e-5):
    b, l = x.shape[0], x.shape[1]
    y = x.reshape((b * l,) + x.shape[2:])
    for p, stride in zip(params, strides):
        y = jax.lax.conv_general_dilated(
            y, p["w"], (stride, stride),
            [(padding, padding), (padding, padding)],
            dimension_numbers=("NCHW", "OIHW", "NCHW"))
        y = y + p["b"][None, :, None, None]
        mean = y.mean(axis=(0, 2, 3), keepdims=True)
        var = ((y - mean) ** 2).mean(axis=(0, 2, 3), keepdims=True)
        y = (y - mean) / jnp.sqrt(var + eps)
        y = y * p["gamma"][None, :, None, None] + p["beta"][None, :, None, None]
        y = y * jax.nn.sigmoid(y)
    return y.reshape(b, l, -1)


def init_params(key, in_channels, depths, kernel_size):
    params = []
    c = in_channels
    for d in depths:
        key, k1, k2 = jax.random.split(key, 3)
        w = 0.1 * jax.random.normal(k1, (d, c, kernel_size, kernel_size), jnp.float32)
        bias = 0.01 * jax.random.normal(k2, (d,), jnp.float32)
        gamma = 1.0 + 0.1 * jnp.cos(jnp.arange(d, dtype=jnp.float32))
        beta = 0.05 * jnp.sin(jnp.arange(d, dtype=jnp.float32))
        params.append(dict(w=w, b=bias, gamma=gamma, beta=beta))
        c = d
    return params


if __name__ == "__main__":
    # Small config consistent with Encoder(depth=8, mults=(1,2,4,2), kernel=4,
    # padding='same', first_stride=True, input_size=(4,16,16)).
    B, L = 2, 3
    C, H, W = 4, 16, 16
    depth, mults = 8, (1, 2, 4, 2)
    kernel_size = 4
    padding = (kernel_size - 1) // 2            # 'same' -> 1
    depths = [depth * m for m in mults]         # [8, 16, 32, 16]
    strides = [1] + [2] * (len(depths) - 1)     # first_stride=True

    key = jax.random.PRNGKey(0)
    kx, kp = jax.random.split(key)
    x = jax.random.normal(kx, (B, L, C, H, W), jnp.float32)
    params = init_params(kp, C, depths, kernel_size)

    fwd = jax.jit(functools.partial(encoder_forward, params=params,
                                    padding=padding, strides=strides))
    out = jax.block_until_ready(fwd(x))

    # Spatial dims: 16 -> 15 -> 7 -> 3 -> 1  => flatten dim = 16*1*1 = 16
    assert out.shape == (B, L, depths[-1] * 1 * 1), out.shape

    ref = ref_forward(x, params, padding, strides)
    err = float(jnp.max(jnp.abs(out - ref)))
    if not (out.shape == ref.shape and err < 3e-2):
        raise AssertionError(f"mismatch vs reference, max abs err = {err}")

    print("KERNEL_OK")
</pallas_src>

<mosaic_0001>
module attributes {stable_mosaic.version = 11 : i64} {
  func.func @kernel(%arg0: i32, %arg1: memref<8x3xf32, #tpu.memory_space<vmem>>, %arg2: memref<64x1350xf32, #tpu.memory_space<vmem>>, %arg3: memref<8x64xf32, #tpu.memory_space<vmem>>, %arg4: memref<8x1350xf32, #tpu.memory_space<vmem>>) attributes {dimension_semantics = [#tpu.dimension_semantics<arbitrary>], iteration_bounds = array<i64: 1>, scalar_prefetch = 0 : i64, scratch_operands = 0 : i64, tpu.core_type = #tpu.core_type<tc>, window_params = [{pipeline_mode = #tpu.pipeline_mode<synchronous>, transform_indices = @transform_0, window_bounds = array<i64: 8, 3>}, {pipeline_mode = #tpu.pipeline_mode<synchronous>, transform_indices = @transform_1, window_bounds = array<i64: 64, 1350>}, {pipeline_mode = #tpu.pipeline_mode<synchronous>, transform_indices = @transform_2, window_bounds = array<i64: 8, 64>}, {pipeline_mode = #tpu.pipeline_mode<synchronous>, transform_indices = @transform_3, window_bounds = array<i64: 8, 1350>}]} {
    %c0 = arith.constant 0 : index
    %c0_0 = arith.constant 0 : index
    %0 = vector.load %arg3[%c0, %c0_0] : memref<8x64xf32, #tpu.memory_space<vmem>>, vector<8x64xf32>
    %c0_1 = arith.constant 0 : index
    %c0_2 = arith.constant 0 : index
    %1 = vector.load %arg2[%c0_1, %c0_2] : memref<64x1350xf32, #tpu.memory_space<vmem>>, vector<64x1350xf32>
    %cst = arith.constant dense<0.000000e+00> : vector<8x1350xf32>
    %2 = tpu.matmul %0, %1, %cst {dimension_numbers = #tpu.dot_dimension_numbers<[1], [0], [0], [1], [0, 0, 1, 1], [], []>} : vector<8x64xf32>, vector<64x1350xf32>, vector<8x1350xf32> -> vector<8x1350xf32>
    %c0_3 = arith.constant 0 : index
    %c0_4 = arith.constant 0 : index
    %3 = vector.load %arg1[%c0_3, %c0_4] : memref<8x3xf32, #tpu.memory_space<vmem>>, vector<8x1xf32>
    %4 = vector.broadcast %3 : vector<8x1xf32> to vector<8x1350xf32>
    %5 = arith.addf %2, %4 : vector<8x1350xf32>
    %cst_5 = arith.constant dense<0.000000e+00> : vector<8xf32>
    %6 = vector.multi_reduction <add>, %5, %cst_5 [1] : vector<8x1350xf32> to vector<8xf32>
    %7 = vector.shape_cast %6 : vector<8xf32> to vector<8x1xf32>
    %cst_6 = arith.constant 7.40740739E-4 : f32
    %8 = vector.broadcast %cst_6 : f32 to vector<8x1xf32>
    %9 = arith.mulf %7, %8 : vector<8x1xf32>
    %10 = arith.mulf %5, %5 : vector<8x1350xf32>
    %cst_7 = arith.constant dense<0.000000e+00> : vector<8xf32>
    %11 = vector.multi_reduction <add>, %10, %cst_7 [1] : vector<8x1350xf32> to vector<8xf32>
    %12 = vector.shape_cast %11 : vector<8xf32> to vector<8x1xf32>
    %cst_8 = arith.constant 7.40740739E-4 : f32
    %13 = vector.broadcast %cst_8 : f32 to vector<8x1xf32>
    %14 = arith.mulf %12, %13 : vector<8x1xf32>
    %15 = arith.mulf %9, %9 : vector<8x1xf32>
    %16 = arith.subf %14, %15 : vector<8x1xf32>
    %cst_9 = arith.constant 0.000000e+00 : f32
    %17 = vector.broadcast %cst_9 : f32 to vector<8x1xf32>
    %18 = arith.maximumf %16, %17 : vector<8x1xf32>
    %cst_10 = arith.constant 9.99999974E-6 : f32
    %19 = vector.broadcast %cst_10 : f32 to vector<8x1xf32>
    %20 = arith.addf %18, %19 : vector<8x1xf32>
    %21 = math.rsqrt %20 : vector<8x1xf32>
    %c0_11 = arith.constant 0 : index
    %c1 = arith.constant 1 : index
    %22 = vector.load %arg1[%c0_11, %c1] : memref<8x3xf32, #tpu.memory_space<vmem>>, vector<8x1xf32>
    %23 = arith.mulf %22, %21 : vector<8x1xf32>
    %c0_12 = arith.constant 0 : index
    %c2 = arith.constant 2 : index
    %24 = vector.load %arg1[%c0_12, %c2] : memref<8x3xf32, #tpu.memory_space<vmem>>, vector<8x1xf32>
    %25 = arith.mulf %9, %23 : vector<8x1xf32>
    %26 = arith.subf %24, %25 : vector<8x1xf32>
    %27 = vector.broadcast %23 : vector<8x1xf32> to vector<8x1350xf32>
    %28 = arith.mulf %5, %27 : vector<8x1350xf32>
    %29 = vector.broadcast %26 : vector<8x1xf32> to vector<8x1350xf32>
    %30 = arith.addf %28, %29 : vector<8x1350xf32>
    %31 = arith.negf %30 : vector<8x1350xf32>
    %32 = math.exp %31 : vector<8x1350xf32>
    %cst_13 = arith.constant 1.000000e+00 : f32
    %33 = vector.broadcast %cst_13 : f32 to vector<8x1350xf32>
    %34 = arith.addf %33, %32 : vector<8x1350xf32>
    %35 = arith.divf %33, %34 : vector<8x1350xf32>
    %36 = arith.mulf %30, %35 : vector<8x1350xf32>
    %c0_14 = arith.constant 0 : index
    %c0_15 = arith.constant 0 : index
    %37 = vector.load %arg4[%c0_14, %c0_15] : memref<8x1350xf32, #tpu.memory_space<vmem>>, vector<8x1350xf32>
    tpu.vector_store %arg4[%c0_14, %c0_15], %36 {strides = array<i32>} : memref<8x1350xf32, #tpu.memory_space<vmem>>, vector<8x1350xf32>,
    return
  }
  func.func @transform_0(%arg0: i32) -> (i32, i32) {
    %c0_i32 = arith.constant 0 : i32
    %c0_i32_0 = arith.constant 0 : i32
    %c0_i32_1 = arith.constant 0 : i32
    return %c0_i32, %c0_i32_0 : i32, i32
  }
  func.func @transform_1(%arg0: i32) -> (i32, i32) {
    %c0_i32 = arith.constant 0 : i32
    %c0_i32_0 = arith.constant 0 : i32
    %c0_i32_1 = arith.constant 0 : i32
    return %c0_i32, %c0_i32_0 : i32, i32
  }
  func.func @transform_2(%arg0: i32) -> (i32, i32) {
    %c0_i32 = arith.constant 0 : i32
    %c0_i32_0 = arith.constant 0 : i32
    %c0_i32_1 = arith.constant 0 : i32
    return %c0_i32, %c0_i32_0 : i32, i32
  }
  func.func @transform_3(%arg0: i32) -> (i32, i32) {
    %c0_i32 = arith.constant 0 : i32
    %c0_i32_0 = arith.constant 0 : i32
    %c0_i32_1 = arith.constant 0 : i32
    return %c0_i32, %c0_i32_0 : i32, i32
  }
}

module attributes {stable_mosaic.version = 11 : i64} {
  func.func @kernel(%arg0: i32, %arg1: memref<16x3xf32, #tpu.memory_space<vmem>>, %arg2: memref<128x294xf32, #tpu.memory_space<vmem>>, %arg3: memref<16x128xf32, #tpu.memory_space<vmem>>, %arg4: memref<16x294xf32, #tpu.memory_space<vmem>>) attributes {dimension_semantics = [#tpu.dimension_semantics<arbitrary>], iteration_bounds = array<i64: 1>, scalar_prefetch = 0 : i64, scratch_operands = 0 : i64, tpu.core_type = #tpu.core_type<tc>, window_params = [{pipeline_mode = #tpu.pipeline_mode<synchronous>, transform_indices = @transform_0, window_bounds = array<i64: 16, 3>}, {pipeline_mode = #tpu.pipeline_mode<synchronous>, transform_indices = @transform_1, window_bounds = array<i64: 128, 294>}, {pipeline_mode = #tpu.pipeline_mode<synchronous>, transform_indices = @transform_2, window_bounds = array<i64: 16, 128>}, {pipeline_mode = #tpu.pipeline_mode<synchronous>, transform_indices = @transform_3, window_bounds = array<i64: 16, 294>}]} {
    %c0 = arith.constant 0 : index
    %c0_0 = arith.constant 0 : index
    %0 = vector.load %arg3[%c0, %c0_0] : memref<16x128xf32, #tpu.memory_space<vmem>>, vector<16x128xf32>
    %c0_1 = arith.constant 0 : index
    %c0_2 = arith.constant 0 : index
    %1 = vector.load %arg2[%c0_1, %c0_2] : memref<128x294xf32, #tpu.memory_space<vmem>>, vector<128x294xf32>
    %cst = arith.constant dense<0.000000e+00> : vector<16x294xf32>
    %2 = tpu.matmul %0, %1, %cst {dimension_numbers = #tpu.dot_dimension_numbers<[1], [0], [0], [1], [0, 0, 1, 1], [], []>} : vector<16x128xf32>, vector<128x294xf32>, vector<16x294xf32> -> vector<16x294xf32>
    %c0_3 = arith.constant 0 : index
    %c0_4 = arith.constant 0 : index
    %3 = vector.load %arg1[%c0_3, %c0_4] : memref<16x3xf32, #tpu.memory_space<vmem>>, vector<16x1xf32>
    %4 = vector.broadcast %3 : vector<16x1xf32> to vector<16x294xf32>
    %5 = arith.addf %2, %4 : vector<16x294xf32>
    %cst_5 = arith.constant dense<0.000000e+00> : vector<16xf32>
    %6 = vector.multi_reduction <add>, %5, %cst_5 [1] : vector<16x294xf32> to vector<16xf32>
    %7 = vector.shape_cast %6 : vector<16xf32> to vector<16x1xf32>
    %cst_6 = arith.constant 0.00340136047 : f32
    %8 = vector.broadcast %cst_6 : f32 to vector<16x1xf32>
    %9 = arith.mulf %7, %8 : vector<16x1xf32>
    %10 = arith.mulf %5, %5 : vector<16x294xf32>
    %cst_7 = arith.constant dense<0.000000e+00> : vector<16xf32>
    %11 = vector.multi_reduction <add>, %10, %cst_7 [1] : vector<16x294xf32> to vector<16xf32>
    %12 = vector.shape_cast %11 : vector<16xf32> to vector<16x1xf32>
    %cst_8 = arith.constant 0.00340136047 : f32
    %13 = vector.broadcast %cst_8 : f32 to vector<16x1xf32>
    %14 = arith.mulf %12, %13 : vector<16x1xf32>
    %15 = arith.mulf %9, %9 : vector<16x1xf32>
    %16 = arith.subf %14, %15 : vector<16x1xf32>
    %cst_9 = arith.constant 0.000000e+00 : f32
    %17 = vector.broadcast %cst_9 : f32 to vector<16x1xf32>
    %18 = arith.maximumf %16, %17 : vector<16x1xf32>
    %cst_10 = arith.constant 9.99999974E-6 : f32
    %19 = vector.broadcast %cst_10 : f32 to vector<16x1xf32>
    %20 = arith.addf %18, %19 : vector<16x1xf32>
    %21 = math.rsqrt %20 : vector<16x1xf32>
    %c0_11 = arith.constant 0 : index
    %c1 = arith.constant 1 : index
    %22 = vector.load %arg1[%c0_11, %c1] : memref<16x3xf32, #tpu.memory_space<vmem>>, vector<16x1xf32>
    %23 = arith.mulf %22, %21 : vector<16x1xf32>
    %c0_12 = arith.constant 0 : index
    %c2 = arith.constant 2 : index
    %24 = vector.load %arg1[%c0_12, %c2] : memref<16x3xf32, #tpu.memory_space<vmem>>, vector<16x1xf32>
    %25 = arith.mulf %9, %23 : vector<16x1xf32>
    %26 = arith.subf %24, %25 : vector<16x1xf32>
    %27 = vector.broadcast %23 : vector<16x1xf32> to vector<16x294xf32>
    %28 = arith.mulf %5, %27 : vector<16x294xf32>
    %29 = vector.broadcast %26 : vector<16x1xf32> to vector<16x294xf32>
    %30 = arith.addf %28, %29 : vector<16x294xf32>
    %31 = arith.negf %30 : vector<16x294xf32>
    %32 = math.exp %31 : vector<16x294xf32>
    %cst_13 = arith.constant 1.000000e+00 : f32
    %33 = vector.broadcast %cst_13 : f32 to vector<16x294xf32>
    %34 = arith.addf %33, %32 : vector<16x294xf32>
    %35 = arith.divf %33, %34 : vector<16x294xf32>
    %36 = arith.mulf %30, %35 : vector<16x294xf32>
    %c0_14 = arith.constant 0 : index
    %c0_15 = arith.constant 0 : index
    %37 = vector.load %arg4[%c0_14, %c0_15] : memref<16x294xf32, #tpu.memory_space<vmem>>, vector<16x294xf32>
    tpu.vector_store %arg4[%c0_14, %c0_15], %36 {strides = array<i32>} : memref<16x294xf32, #tpu.memory_space<vmem>>, vector<16x294xf32>,
    return
  }
  func.func @transform_0(%arg0: i32) -> (i32, i32) {
    %c0_i32 = arith.constant 0 : i32
    %c0_i32_0 = arith.constant 0 : i32
    %c0_i32_1 = arith.constant 0 : i32
    return %c0_i32, %c0_i32_0 : i32, i32
  }
  func.func @transform_1(%arg0: i32) -> (i32, i32) {
    %c0_i32 = arith.constant 0 : i32
    %c0_i32_0 = arith.constant 0 : i32
    %c0_i32_1 = arith.constant 0 : i32
    return %c0_i32, %c0_i32_0 : i32, i32
  }
  func.func @transform_2(%arg0: i32) -> (i32, i32) {
    %c0_i32 = arith.constant 0 : i32
    %c0_i32_0 = arith.constant 0 : i32
    %c0_i32_1 = arith.constant 0 : i32
    return %c0_i32, %c0_i32_0 : i32, i32
  }
  func.func @transform_3(%arg0: i32) -> (i32, i32) {
    %c0_i32 = arith.constant 0 : i32
    %c0_i32_0 = arith.constant 0 : i32
    %c0_i32_1 = arith.constant 0 : i32
    return %c0_i32, %c0_i32_0 : i32, i32
  }
}

module attributes {stable_mosaic.version = 11 : i64} {
  func.func @kernel(%arg0: i32, %arg1: memref<32x3xf32, #tpu.memory_space<vmem>>, %arg2: memref<256x54xf32, #tpu.memory_space<vmem>>, %arg3: memref<32x256xf32, #tpu.memory_space<vmem>>, %arg4: memref<32x54xf32, #tpu.memory_space<vmem>>) attributes {dimension_semantics = [#tpu.dimension_semantics<arbitrary>], iteration_bounds = array<i64: 1>, scalar_prefetch = 0 : i64, scratch_operands = 0 : i64, tpu.core_type = #tpu.core_type<tc>, window_params = [{pipeline_mode = #tpu.pipeline_mode<synchronous>, transform_indices = @transform_0, window_bounds = array<i64: 32, 3>}, {pipeline_mode = #tpu.pipeline_mode<synchronous>, transform_indices = @transform_1, window_bounds = array<i64: 256, 54>}, {pipeline_mode = #tpu.pipeline_mode<synchronous>, transform_indices = @transform_2, window_bounds = array<i64: 32, 256>}, {pipeline_mode = #tpu.pipeline_mode<synchronous>, transform_indices = @transform_3, window_bounds = array<i64: 32, 54>}]} {
    %c0 = arith.constant 0 : index
    %c0_0 = arith.constant 0 : index
    %0 = vector.load %arg3[%c0, %c0_0] : memref<32x256xf32, #tpu.memory_space<vmem>>, vector<32x256xf32>
    %c0_1 = arith.constant 0 : index
    %c0_2 = arith.constant 0 : index
    %1 = vector.load %arg2[%c0_1, %c0_2] : memref<256x54xf32, #tpu.memory_space<vmem>>, vector<256x54xf32>
    %cst = arith.constant dense<0.000000e+00> : vector<32x54xf32>
    %2 = tpu.matmul %0, %1, %cst {dimension_numbers = #tpu.dot_dimension_numbers<[1], [0], [0], [1], [0, 0, 1, 1], [], []>} : vector<32x256xf32>, vector<256x54xf32>, vector<32x54xf32> -> vector<32x54xf32>
    %c0_3 = arith.constant 0 : index
    %c0_4 = arith.constant 0 : index
    %3 = vector.load %arg1[%c0_3, %c0_4] : memref<32x3xf32, #tpu.memory_space<vmem>>, vector<32x1xf32>
    %4 = vector.broadcast %3 : vector<32x1xf32> to vector<32x54xf32>
    %5 = arith.addf %2, %4 : vector<32x54xf32>
    %cst_5 = arith.constant dense<0.000000e+00> : vector<32xf32>
    %6 = vector.multi_reduction <add>, %5, %cst_5 [1] : vector<32x54xf32> to vector<32xf32>
    %7 = vector.shape_cast %6 : vector<32xf32> to vector<32x1xf32>
    %cst_6 = arith.constant 0.0185185187 : f32
    %8 = vector.broadcast %cst_6 : f32 to vector<32x1xf32>
    %9 = arith.mulf %7, %8 : vector<32x1xf32>
    %10 = arith.mulf %5, %5 : vector<32x54xf32>
    %cst_7 = arith.constant dense<0.000000e+00> : vector<32xf32>
    %11 = vector.multi_reduction <add>, %10, %cst_7 [1] : vector<32x54xf32> to vector<32xf32>
    %12 = vector.shape_cast %11 : vector<32xf32> to vector<32x1xf32>
    %cst_8 = arith.constant 0.0185185187 : f32
    %13 = vector.broadcast %cst_8 : f32 to vector<32x1xf32>
    %14 = arith.mulf %12, %13 : vector<32x1xf32>
    %15 = arith.mulf %9, %9 : vector<32x1xf32>
    %16 = arith.subf %14, %15 : vector<32x1xf32>
    %cst_9 = arith.constant 0.000000e+00 : f32
    %17 = vector.broadcast %cst_9 : f32 to vector<32x1xf32>
    %18 = arith.maximumf %16, %17 : vector<32x1xf32>
    %cst_10 = arith.constant 9.99999974E-6 : f32
    %19 = vector.broadcast %cst_10 : f32 to vector<32x1xf32>
    %20 = arith.addf %18, %19 : vector<32x1xf32>
    %21 = math.rsqrt %20 : vector<32x1xf32>
    %c0_11 = arith.constant 0 : index
    %c1 = arith.constant 1 : index
    %22 = vector.load %arg1[%c0_11, %c1] : memref<32x3xf32, #tpu.memory_space<vmem>>, vector<32x1xf32>
    %23 = arith.mulf %22, %21 : vector<32x1xf32>
    %c0_12 = arith.constant 0 : index
    %c2 = arith.constant 2 : index
    %24 = vector.load %arg1[%c0_12, %c2] : memref<32x3xf32, #tpu.memory_space<vmem>>, vector<32x1xf32>
    %25 = arith.mulf %9, %23 : vector<32x1xf32>
    %26 = arith.subf %24, %25 : vector<32x1xf32>
    %27 = vector.broadcast %23 : vector<32x1xf32> to vector<32x54xf32>
    %28 = arith.mulf %5, %27 : vector<32x54xf32>
    %29 = vector.broadcast %26 : vector<32x1xf32> to vector<32x54xf32>
    %30 = arith.addf %28, %29 : vector<32x54xf32>
    %31 = arith.negf %30 : vector<32x54xf32>
    %32 = math.exp %31 : vector<32x54xf32>
    %cst_13 = arith.constant 1.000000e+00 : f32
    %33 = vector.broadcast %cst_13 : f32 to vector<32x54xf32>
    %34 = arith.addf %33, %32 : vector<32x54xf32>
    %35 = arith.divf %33, %34 : vector<32x54xf32>
    %36 = arith.mulf %30, %35 : vector<32x54xf32>
    %c0_14 = arith.constant 0 : index
    %c0_15 = arith.constant 0 : index
    %37 = vector.load %arg4[%c0_14, %c0_15] : memref<32x54xf32, #tpu.memory_space<vmem>>, vector<32x54xf32>
    tpu.vector_store %arg4[%c0_14, %c0_15], %36 {strides = array<i32>} : memref<32x54xf32, #tpu.memory_space<vmem>>, vector<32x54xf32>,
    return
  }
  func.func @transform_0(%arg0: i32) -> (i32, i32) {
    %c0_i32 = arith.constant 0 : i32
    %c0_i32_0 = arith.constant 0 : i32
    %c0_i32_1 = arith.constant 0 : i32
    return %c0_i32, %c0_i32_0 : i32, i32
  }
  func.func @transform_1(%arg0: i32) -> (i32, i32) {
    %c0_i32 = arith.constant 0 : i32
    %c0_i32_0 = arith.constant 0 : i32
    %c0_i32_1 = arith.constant 0 : i32
    return %c0_i32, %c0_i32_0 : i32, i32
  }
  func.func @transform_2(%arg0: i32) -> (i32, i32) {
    %c0_i32 = arith.constant 0 : i32
    %c0_i32_0 = arith.constant 0 : i32
    %c0_i32_1 = arith.constant 0 : i32
    return %c0_i32, %c0_i32_0 : i32, i32
  }
  func.func @transform_3(%arg0: i32) -> (i32, i32) {
    %c0_i32 = arith.constant 0 : i32
    %c0_i32_0 = arith.constant 0 : i32
    %c0_i32_1 = arith.constant 0 : i32
    return %c0_i32, %c0_i32_0 : i32, i32
  }
}

module attributes {stable_mosaic.version = 11 : i64} {
  func.func @kernel(%arg0: i32, %arg1: memref<16x3xf32, #tpu.memory_space<vmem>>, %arg2: memref<512x6xf32, #tpu.memory_space<vmem>>, %arg3: memref<16x512xf32, #tpu.memory_space<vmem>>, %arg4: memref<16x6xf32, #tpu.memory_space<vmem>>) attributes {dimension_semantics = [#tpu.dimension_semantics<arbitrary>], iteration_bounds = array<i64: 1>, scalar_prefetch = 0 : i64, scratch_operands = 0 : i64, tpu.core_type = #tpu.core_type<tc>, window_params = [{pipeline_mode = #tpu.pipeline_mode<synchronous>, transform_indices = @transform_0, window_bounds = array<i64: 16, 3>}, {pipeline_mode = #tpu.pipeline_mode<synchronous>, transform_indices = @transform_1, window_bounds = array<i64: 512, 6>}, {pipeline_mode = #tpu.pipeline_mode<synchronous>, transform_indices = @transform_2, window_bounds = array<i64: 16, 512>}, {pipeline_mode = #tpu.pipeline_mode<synchronous>, transform_indices = @transform_3, window_bounds = array<i64: 16, 6>}]} {
    %c0 = arith.constant 0 : index
    %c0_0 = arith.constant 0 : index
    %0 = vector.load %arg3[%c0, %c0_0] : memref<16x512xf32, #tpu.memory_space<vmem>>, vector<16x512xf32>
    %c0_1 = arith.constant 0 : index
    %c0_2 = arith.constant 0 : index
    %1 = vector.load %arg2[%c0_1, %c0_2] : memref<512x6xf32, #tpu.memory_space<vmem>>, vector<512x6xf32>
    %cst = arith.constant dense<0.000000e+00> : vector<16x6xf32>
    %2 = tpu.matmul %0, %1, %cst {dimension_numbers = #tpu.dot_dimension_numbers<[1], [0], [0], [1], [0, 0, 1, 1], [], []>} : vector<16x512xf32>, vector<512x6xf32>, vector<16x6xf32> -> vector<16x6xf32>
    %c0_3 = arith.constant 0 : index
    %c0_4 = arith.constant 0 : index
    %3 = vector.load %arg1[%c0_3, %c0_4] : memref<16x3xf32, #tpu.memory_space<vmem>>, vector<16x1xf32>
    %4 = vector.broadcast %3 : vector<16x1xf32> to vector<16x6xf32>
    %5 = arith.addf %2, %4 : vector<16x6xf32>
    %cst_5 = arith.constant dense<0.000000e+00> : vector<16xf32>
    %6 = vector.multi_reduction <add>, %5, %cst_5 [1] : vector<16x6xf32> to vector<16xf32>
    %7 = vector.shape_cast %6 : vector<16xf32> to vector<16x1xf32>
    %cst_6 = arith.constant 0.166666672 : f32
    %8 = vector.broadcast %cst_6 : f32 to vector<16x1xf32>
    %9 = arith.mulf %7, %8 : vector<16x1xf32>
    %10 = arith.mulf %5, %5 : vector<16x6xf32>
    %cst_7 = arith.constant dense<0.000000e+00> : vector<16xf32>
    %11 = vector.multi_reduction <add>, %10, %cst_7 [1] : vector<16x6xf32> to vector<16xf32>
    %12 = vector.shape_cast %11 : vector<16xf32> to vector<16x1xf32>
    %cst_8 = arith.constant 0.166666672 : f32
    %13 = vector.broadcast %cst_8 : f32 to vector<16x1xf32>
    %14 = arith.mulf %12, %13 : vector<16x1xf32>
    %15 = arith.mulf %9, %9 : vector<16x1xf32>
    %16 = arith.subf %14, %15 : vector<16x1xf32>
    %cst_9 = arith.constant 0.000000e+00 : f32
    %17 = vector.broadcast %cst_9 : f32 to vector<16x1xf32>
    %18 = arith.maximumf %16, %17 : vector<16x1xf32>
    %cst_10 = arith.constant 9.99999974E-6 : f32
    %19 = vector.broadcast %cst_10 : f32 to vector<16x1xf32>
    %20 = arith.addf %18, %19 : vector<16x1xf32>
    %21 = math.rsqrt %20 : vector<16x1xf32>
    %c0_11 = arith.constant 0 : index
    %c1 = arith.constant 1 : index
    %22 = vector.load %arg1[%c0_11, %c1] : memref<16x3xf32, #tpu.memory_space<vmem>>, vector<16x1xf32>
    %23 = arith.mulf %22, %21 : vector<16x1xf32>
    %c0_12 = arith.constant 0 : index
    %c2 = arith.constant 2 : index
    %24 = vector.load %arg1[%c0_12, %c2] : memref<16x3xf32, #tpu.memory_space<vmem>>, vector<16x1xf32>
    %25 = arith.mulf %9, %23 : vector<16x1xf32>
    %26 = arith.subf %24, %25 : vector<16x1xf32>
    %27 = vector.broadcast %23 : vector<16x1xf32> to vector<16x6xf32>
    %28 = arith.mulf %5, %27 : vector<16x6xf32>
    %29 = vector.broadcast %26 : vector<16x1xf32> to vector<16x6xf32>
    %30 = arith.addf %28, %29 : vector<16x6xf32>
    %31 = arith.negf %30 : vector<16x6xf32>
    %32 = math.exp %31 : vector<16x6xf32>
    %cst_13 = arith.constant 1.000000e+00 : f32
    %33 = vector.broadcast %cst_13 : f32 to vector<16x6xf32>
    %34 = arith.addf %33, %32 : vector<16x6xf32>
    %35 = arith.divf %33, %34 : vector<16x6xf32>
    %36 = arith.mulf %30, %35 : vector<16x6xf32>
    %c0_14 = arith.constant 0 : index
    %c0_15 = arith.constant 0 : index
    %37 = vector.load %arg4[%c0_14, %c0_15] : memref<16x6xf32, #tpu.memory_space<vmem>>, vector<16x6xf32>
    tpu.vector_store %arg4[%c0_14, %c0_15], %36 {strides = array<i32>} : memref<16x6xf32, #tpu.memory_space<vmem>>, vector<16x6xf32>,
    return
  }
  func.func @transform_0(%arg0: i32) -> (i32, i32) {
    %c0_i32 = arith.constant 0 : i32
    %c0_i32_0 = arith.constant 0 : i32
    %c0_i32_1 = arith.constant 0 : i32
    return %c0_i32, %c0_i32_0 : i32, i32
  }
  func.func @transform_1(%arg0: i32) -> (i32, i32) {
    %c0_i32 = arith.constant 0 : i32
    %c0_i32_0 = arith.constant 0 : i32
    %c0_i32_1 = arith.constant 0 : i32
    return %c0_i32, %c0_i32_0 : i32, i32
  }
  func.func @transform_2(%arg0: i32) -> (i32, i32) {
    %c0_i32 = arith.constant 0 : i32
    %c0_i32_0 = arith.constant 0 : i32
    %c0_i32_1 = arith.constant 0 : i32
    return %c0_i32, %c0_i32_0 : i32, i32
  }
  func.func @transform_3(%arg0: i32) -> (i32, i32) {
    %c0_i32 = arith.constant 0 : i32
    %c0_i32_0 = arith.constant 0 : i32
    %c0_i32_1 = arith.constant 0 : i32
    return %c0_i32, %c0_i32_0 : i32, i32
  }
}

</mosaic_0001>

<bundles_post_ra>
// kernel: encoder_forward.4
= control target key start
LH: loop header
LB: loop body
LE: loop exit
PB: predicated region body
PF: predicated region fallthrough
CT: control target
= control target key end

     0   :  { %vm109_vm0 = vcmask 523264   ;;  %vm1475_vm1 = vcmask 572416   ;;  %s1471_s1 = inlined_call_operand.vmem [shape: f32[64,1350], index: 1, kind: input, shape index: {}]   ;;  %s1472_s2 = inlined_call_operand.vmem [shape: f32[8,64], index: 2, kind: input, shape index: {}]   ;;  %s1473_s0 = inlined_call_operand.vmem [shape: f32[8,3], index: 0, kind: input, shape index: {}]   ;;  %s1474_s3 = inlined_call_operand.vmem [shape: f32[8,1350], index: 3, kind: output, shape index: {}]  }
   0x1   :  { %v92_v0 = vld [vmem:[%s1471_s1 + $0x268] sm:$0xff]  ;;  %v93_v1 = vld [vmem:[%s1471_s1 + $0x270] sm:$0xff]  ;;  %v94_v2 = vld [vmem:[%s1471_s1 + $0x278] sm:$0xff] }
   0x2   :  { %121 = vmatpush.msra.mxu0 %v92_v0  ;;  %141 = vmatpush.msra.mxu1 %v93_v1  ;;  %v95_v3 = vld [vmem:[%s1471_s1 + $0x280] sm:$0xff]  ;;  %v81_v4 = vld [vmem:[%s1471_s1 + $0x210] sm:$0xff]  ;;  %v82_v5 = vld [vmem:[%s1471_s1 + $0x218] sm:$0xff] }
   0x3   :  { %161 = vmatpush.msra.mxu2 %v94_v2  ;;  %181 = vmatpush.msra.mxu3 %v95_v3  ;;  %v83_v6 = vld [vmem:[%s1471_s1 + $0x220] sm:$0xff]  ;;  %v84_v7 = vld [vmem:[%s1471_s1 + $0x228] sm:$0xff]  ;;  %v70_v8 = vld [vmem:[%s1471_s1 + $0x1b8] sm:$0xff] }
   0x4   :  { %122 = vmatpush.msra.mxu0 %v81_v4  ;;  %142 = vmatpush.msra.mxu1 %v82_v5  ;;  %v71_v9 = vld [vmem:[%s1471_s1 + $0x1c0] sm:$0xff]  ;;  %v72_v10 = vld [vmem:[%s1471_s1 + $0x1c8] sm:$0xff]  ;;  %v73_v11 = vld [vmem:[%s1471_s1 + $0x1d0] sm:$0xff] }
   0x5   :  { %162 = vmatpush.msra.mxu2 %v83_v6  ;;  %182 = vmatpush.msra.mxu3 %v84_v7  ;;  %v59_v12 = vld [vmem:[%s1471_s1 + $0x160] sm:$0xff]  ;;  %v60_v13 = vld [vmem:[%s1471_s1 + $0x168] sm:$0xff]  ;;  %v61_v14 = vld [vmem:[%s1471_s1 + $0x170] sm:$0xff] }
   0x6   :  { %123 = vmatpush.msra.mxu0 %v70_v8  ;;  %143 = vmatpush.msra.mxu1 %v71_v9  ;;  %v62_v15 = vld [vmem:[%s1471_s1 + $0x178] sm:$0xff]  ;;  %v48_v16 = vld [vmem:[%s1471_s1 + $0x108] sm:$0xff]  ;;  %v49_v17 = vld [vmem:[%s1471_s1 + $0x110] sm:$0xff] }
   0x7   :  { %163 = vmatpush.msra.mxu2 %v72_v10  ;;  %183 = vmatpush.msra.mxu3 %v73_v11  ;;  %v50_v18 = vld [vmem:[%s1471_s1 + $0x118] sm:$0xff]  ;;  %v51_v19 = vld [vmem:[%s1471_s1 + $0x120] sm:$0xff]  ;;  %v37_v20 = vld [vmem:[%s1471_s1 + $0xb0] sm:$0xff] }
   0x8   :  { %124 = vmatpush.msra.mxu0 %v59_v12  ;;  %144 = vmatpush.msra.mxu1 %v60_v13  ;;  %v38_v21 = vld [vmem:[%s1471_s1 + $0xb8] sm:$0xff]  ;;  %v39_v22 = vld [vmem:[%s1471_s1 + $0xc0] sm:$0xff]  ;;  %v40_v23 = vld [vmem:[%s1471_s1 + $0xc8] sm:$0xff] }
   0x9   :  { %164 = vmatpush.msra.mxu2 %v61_v14  ;;  %184 = vmatpush.msra.mxu3 %v62_v15  ;;  %v26_v24 = vld [vmem:[%s1471_s1 + $0x58] sm:$0xff]  ;;  %v27_v25 = vld [vmem:[%s1471_s1 + $0x60] sm:$0xff]  ;;  %v28_v26 = vld [vmem:[%s1471_s1 + $0x68] sm:$0xff]  ;;  %v737_v14 = vmov 0  }
   0xa   :  { %125 = vmatpush.msra.mxu0 %v48_v16  ;;  %145 = vmatpush.msra.mxu1 %v49_v17  ;;  %v29_v27 = vld [vmem:[%s1471_s1 + $0x70] sm:$0xff]  ;;  %v15_v28 = vld [vmem:[%s1471_s1] sm:$0xff]  ;;  %v16_v29 = vld [vmem:[%s1471_s1 + $0x8] sm:$0xff] }
   0xb   :  { %165 = vmatpush.msra.mxu2 %v50_v18  ;;  %185 = vmatpush.msra.mxu3 %v51_v19  ;;  %v17_v30 = vld [vmem:[%s1471_s1 + $0x10] sm:$0xff]  ;;  %v18_v31 = vld [vmem:[%s1471_s1 + $0x18] sm:$0xff]  ;;  %v96_v32 = vld [vmem:[%s1471_s1 + $0x288] sm:$0xff] }
   0xc   :  { %126 = vmatpush.msra.mxu0 %v37_v20  ;;  %146 = vmatpush.msra.mxu1 %v38_v21  ;;  %v97_v33 = vld [vmem:[%s1471_s1 + $0x290] sm:$0xff]  ;;  %v98_v34 = vld [vmem:[%s1471_s1 + $0x298] sm:$0xff]  ;;  %v99_v35 = vld [vmem:[%s1471_s1 + $0x2a0] sm:$0xff] }
   0xd   :  { %166 = vmatpush.msra.mxu2 %v39_v22  ;;  %186 = vmatpush.msra.mxu3 %v40_v23  ;;  %v85_v36 = vld [vmem:[%s1471_s1 + $0x230] sm:$0xff]  ;;  %v86_v37 = vld [vmem:[%s1471_s1 + $0x238] sm:$0xff]  ;;  %v87_v38 = vld [vmem:[%s1471_s1 + $0x240] sm:$0xff] }
   0xe   :  { %127 = vmatpush.msra.mxu0 %v26_v24  ;;  %147 = vmatpush.msra.mxu1 %v27_v25  ;;  %v88_v39 = vld [vmem:[%s1471_s1 + $0x248] sm:$0xff]  ;;  %v74_v40 = vld [vmem:[%s1471_s1 + $0x1d8] sm:$0xff]  ;;  %v75_v41 = vld [vmem:[%s1471_s1 + $0x1e0] sm:$0xff] }
   0xf   :  { %167 = vmatpush.msra.mxu2 %v28_v26  ;;  %187 = vmatpush.msra.mxu3 %v29_v27  ;;  %v76_v42 = vld [vmem:[%s1471_s1 + $0x1e8] sm:$0xff]  ;;  %v77_v43 = vld [vmem:[%s1471_s1 + $0x1f0] sm:$0xff]  ;;  %v63_v44 = vld [vmem:[%s1471_s1 + $0x180] sm:$0xff] }
  0x10   :  { %128 = vmatpush.msra.mxu0 %v15_v28  ;;  %148 = vmatpush.msra.mxu1 %v16_v29  ;;  %v64_v45 = vld [vmem:[%s1471_s1 + $0x188] sm:$0xff]  ;;  %v65_v46 = vld [vmem:[%s1471_s1 + $0x190] sm:$0xff]  ;;  %v66_v47 = vld [vmem:[%s1471_s1 + $0x198] sm:$0xff] }
  0x11   :  { %168 = vmatpush.msra.mxu2 %v17_v30  ;;  %188 = vmatpush.msra.mxu3 %v18_v31  ;;  %v908_v48 = vld [vmem:[%s1472_s2] sm:$0xff]  ;;  %v52_v49 = vld [vmem:[%s1471_s1 + $0x128] sm:$0xff]  ;;  %v53_v50 = vld [vmem:[%s1471_s1 + $0x130] sm:$0xff] }
  0x12   :  { %201 = vmatpush.msrb.mxu0 %v96_v32  ;;  %221 = vmatpush.msrb.mxu1 %v97_v33  ;;  %v54_v51 = vld [vmem:[%s1471_s1 + $0x138] sm:$0xff]  ;;  %v55_v52 = vld [vmem:[%s1471_s1 + $0x140] sm:$0xff]  ;;  %v41_v54 = vld [vmem:[%s1471_s1 + $0xd0] sm:$0xff] }
  0x13   :  { %241 = vmatpush.msrb.mxu2 %v98_v34  ;;  %261 = vmatpush.msrb.mxu3 %v99_v35  ;;  %v42_v53 = vld [vmem:[%s1471_s1 + $0xd8] sm:$0xff]  ;;  %v43_v55 = vld [vmem:[%s1471_s1 + $0xe0] sm:$0xff]  ;;  %v44_v56 = vld [vmem:[%s1471_s1 + $0xe8] sm:$0xff] }
  0x14   :  { %202 = vmatpush.msrb.mxu0 %v85_v36  ;;  %222 = vmatpush.msrb.mxu1 %v86_v37  ;;  %v30_v57 = vld [vmem:[%s1471_s1 + $0x78] sm:$0xff]  ;;  %v31_v58 = vld [vmem:[%s1471_s1 + $0x80] sm:$0xff]  ;;  %v32_v59 = vld [vmem:[%s1471_s1 + $0x88] sm:$0xff] }
  0x15   :  { %242 = vmatpush.msrb.mxu2 %v87_v38  ;;  %262 = vmatpush.msrb.mxu3 %v88_v39  ;;  %v33_v60 = vld [vmem:[%s1471_s1 + $0x90] sm:$0xff]  ;;  %v19_v61 = vld [vmem:[%s1471_s1 + $0x20] sm:$0xff]  ;;  %v20_v62 = vld [vmem:[%s1471_s1 + $0x28] sm:$0xff] }
  0x16   :  { %203 = vmatpush.msrb.mxu0 %v74_v40  ;;  %223 = vmatpush.msrb.mxu1 %v75_v41  ;;  %v21_v63 = vld [vmem:[%s1471_s1 + $0x30] sm:$0xff]  ;;  %v22_v0 = vld [vmem:[%s1471_s1 + $0x38] sm:$0xff]  ;;  %v100_v1 = vld [vmem:[%s1471_s1 + $0x2a8] sm:$0xff] }
  0x17   :  { %243 = vmatpush.msrb.mxu2 %v76_v42  ;;  %263 = vmatpush.msrb.mxu3 %v77_v43  ;;  %v101_v2 = vld [vmem:[%s1471_s1 + $0x2b0] sm:$0xff]  ;;  %v102_v3 = vld [vmem:[%s1471_s1 + $0x2b8] sm:$0xff]  ;;  %v91_v6 = vld [vmem:[%s1471_s1 + $0x260] sm:$0xff] }
  0x18   :  { %204 = vmatpush.msrb.mxu0 %v63_v44  ;;  %224 = vmatpush.msrb.mxu1 %v64_v45  ;;  %v89_v4 = vld [vmem:[%s1471_s1 + $0x250] sm:$0xff]  ;;  %v90_v5 = vld [vmem:[%s1471_s1 + $0x258] sm:$0xff]  ;;  %v79_v8 = vld [vmem:[%s1471_s1 + $0x200] sm:$0xff] }
  0x19   :  { %244 = vmatpush.msrb.mxu2 %v65_v46  ;;  %264 = vmatpush.msrb.mxu3 %v66_v47  ;;  %v78_v7 = vld [vmem:[%s1471_s1 + $0x1f8] sm:$0xff]  ;;  %v80_v9 = vld [vmem:[%s1471_s1 + $0x208] sm:$0xff]  ;;  %v67_v10 = vld [vmem:[%s1471_s1 + $0x1a0] sm:$0xff] }
  0x1a   :  { %663 = vmatmul.msk.f32.vlgmr.msra.gmra.mxu2 %vm109_vm0, %v908_v48  ;;  %664 = vmatmul.msk.f32.vlgmr.msra.gmra.mxu3 %vm109_vm0, %v908_v48  ;;  %v68_v11 = vld [vmem:[%s1471_s1 + $0x1a8] sm:$0xff]  ;;  %v69_v12 = vld [vmem:[%s1471_s1 + $0x1b0] sm:$0xff]  ;;  %v1013_v13 = vld [vmem:[%s1473_s0] sm:$0xff] }
  0x1b   :  { %205 = vmatpush.msrb.mxu0 %v52_v49  ;;  %225 = vmatpush.msrb.mxu1 %v53_v50  ;;  %v56_v15 = vld [vmem:[%s1471_s1 + $0x148] sm:$0xff]  ;;  %v57_v16 = vld [vmem:[%s1471_s1 + $0x150] sm:$0xff]  ;;  %v58_v17 = vld [vmem:[%s1471_s1 + $0x158] sm:$0xff] }
  0x1c   :  { %245 = vmatpush.msrb.mxu2 %v54_v51  ;;  %265 = vmatpush.msrb.mxu3 %v55_v52  ;;  %v45_v18 = vld [vmem:[%s1471_s1 + $0xf0] sm:$0xff]  ;;  %v46_v19 = vld [vmem:[%s1471_s1 + $0xf8] sm:$0xff]  ;;  %v47_v20 = vld [vmem:[%s1471_s1 + $0x100] sm:$0xff] }
  0x1d   :  { %661 = vmatmul.msk.f32.vlgmr.msra.gmra.mxu0 %vm109_vm0, %v908_v48  ;;  %226 = vmatpush.msrb.mxu1 %v42_v53  ;;  %v34_v21 = vld [vmem:[%s1471_s1 + $0x98] sm:$0xff]  ;;  %v35_v22 = vld [vmem:[%s1471_s1 + $0xa0] sm:$0xff]  ;;  %v36_v23 = vld [vmem:[%s1471_s1 + $0xa8] sm:$0xff] }
  0x1e   :  { %206 = vmatpush.msrb.mxu0 %v41_v54  ;;  %246 = vmatpush.msrb.mxu2 %v43_v55  ;;  %v23_v24 = vld [vmem:[%s1471_s1 + $0x40] sm:$0xff]  ;;  %v24_v25 = vld [vmem:[%s1471_s1 + $0x48] sm:$0xff]  ;;  %v25_v26 = vld [vmem:[%s1471_s1 + $0x50] sm:$0xff]  ;;  %s739_s1 = smov 1  }
  0x1f   :  { %266 = vmatpush.msrb.mxu3 %v44_v56  ;;  %662 = vmatmul.msk.f32.vlgmr.msra.gmra.mxu1 %vm109_vm0, %v908_v48 }
  0x20   :  { %207 = vmatpush.msrb.mxu0 %v30_v57  ;;  %227 = vmatpush.msrb.mxu1 %v31_v58 }
  0x21   :  { %247 = vmatpush.msrb.mxu2 %v32_v59  ;;  %267 = vmatpush.msrb.mxu3 %v33_v60 }
  0x22   :  { %208 = vmatpush.msrb.mxu0 %v19_v61  ;;  %228 = vmatpush.msrb.mxu1 %v20_v62 }
  0x23   :  { %248 = vmatpush.msrb.mxu2 %v21_v63  ;;  %268 = vmatpush.msrb.mxu3 %v22_v0 }
  0x24   :  { %667 = vmatmul.msk.f32.vlgmr.msrb.gmra.mxu2 %vm109_vm0, %v908_v48  ;;  %668 = vmatmul.msk.f32.vlgmr.msrb.gmra.mxu3 %vm109_vm0, %v908_v48 }
  0x25   :  { %281 = vmatpush.msra.mxu0 %v100_v1  ;;  %301 = vmatpush.msra.mxu1 %v101_v2 }
  0x26   :  { %321 = vmatpush.msra.mxu2 %v102_v3  ;;  %665 = vmatmul.msk.f32.vlgmr.msrb.gmra.mxu0 %vm109_vm0, %v908_v48 }
  0x27   :  { %282 = vmatpush.msra.mxu0 %v89_v4  ;;  %302 = vmatpush.msra.mxu1 %v90_v5 }
  0x28   :  { %322 = vmatpush.msra.mxu2 %v91_v6  ;;  %666 = vmatmul.msk.f32.vlgmr.msrb.gmra.mxu1 %vm109_vm0, %v908_v48 }
  0x29   :  { %283 = vmatpush.msra.mxu0 %v78_v7  ;;  %303 = vmatpush.msra.mxu1 %v79_v8 }
  0x2a   :  { %323 = vmatpush.msra.mxu2 %v80_v9  ;;  %687 = vset.pattern.permute.xlu0 %v737_v14 }
  0x2b   :  { %284 = vmatpush.msra.mxu0 %v67_v10  ;;  %304 = vmatpush.msra.mxu1 %v68_v11 }
  0x2c   :  { %324 = vmatpush.msra.mxu2 %v69_v12  ;;  %106 = vperm.xlu0 %687, %v1013_v13  }
  0x2d   :  { %285 = vmatpush.msra.mxu0 %v56_v15  ;;  %305 = vmatpush.msra.mxu1 %v57_v16 }
  0x2e   :  { %325 = vmatpush.msra.mxu2 %v58_v17 }
  0x2f   :  { %286 = vmatpush.msra.mxu0 %v45_v18  ;;  %306 = vmatpush.msra.mxu1 %v46_v19 }
  0x30   :  { %326 = vmatpush.msra.mxu2 %v47_v20  ;;  %v738_v20 = vmov 1  }
  0x31   :  { %287 = vmatpush.msra.mxu0 %v34_v21  ;;  %307 = vmatpush.msra.mxu1 %v35_v22 }
  0x32   :  { %327 = vmatpush.msra.mxu2 %v36_v23  ;;  %688 = vset.pattern.permute.xlu2 %v738_v20 }
  0x33   :  { %288 = vmatpush.msra.mxu0 %v23_v24  ;;  %308 = vmatpush.msra.mxu1 %v24_v25 }
  0x34   :  { %328 = vmatpush.msra.mxu2 %v25_v26  ;;  %669 = vmatmul.msk.f32.vlgmr.msra.gmra.mxu0 %vm109_vm0, %v908_v48 }
  0x35   :  { %670 = vmatmul.msk.f32.vlgmr.msra.gmra.mxu1 %vm109_vm0, %v908_v48  ;;  %671 = vmatmul.msk.f32.vlgmr.msra.gmra.mxu2 %vm109_vm0, %v908_v48 }
  0x9a   :  { %v130_v27 = vpop.f32.mrf.mxu0 }
  0x9c   :  { %v150_v28 = vpop.f32.mrf.mxu1 }
  0x9d   :  { %v170_v29 = vpop.f32.mrf.mxu2  ;;  %v190_v31 = vpop.f32.mrf.mxu3 }
  0x9e   :  { %v107_v30 = vpop.permute.xlu0 %106 }
  0x9f   :  { %v1058_v32 = vadd.f32 %v130_v27, %v107_v30  ;;  %v1060_v33 = vadd.f32 %v150_v28, %v107_v30  ;;  %v1062_v34 = vadd.f32 %v170_v29, %v107_v30  ;;  %v1064_v35 = vadd.f32 %v190_v31, %v107_v30 }
  0xa1   :  { %v333_v36 = vadd.f32 %v1060_v33, %v1058_v32  ;;  %v348_v37 = vmul.f32 %v1058_v32, %v1058_v32  ;;  %v349_v38 = vmul.f32 %v1060_v33, %v1060_v33  ;;  %v350_v39 = vmul.f32 %v1062_v34, %v1062_v34 }
  0xa2   :  { %v351_v42 = vmul.f32 %v1064_v35, %v1064_v35 }
  0xa3   :  { %v334_v40 = vadd.f32 %v333_v36, %v1062_v34  ;;  %v359_v41 = vadd.f32 %v349_v38, %v348_v37  ;;  %v210_v43 = vpop.f32.mrf.mxu0 }
  0xa4   :  { %v1077_v44 = vadd.f32 %v210_v43, %v107_v30 }
  0xa5   :  { %v360_v45 = vadd.f32 %v359_v41, %v350_v39  ;;  %v335_v46 = vadd.f32 %v334_v40, %v1064_v35  ;;  %v230_v47 = vpop.f32.mrf.mxu1 }
  0xa6   :  { %v352_v48 = vmul.f32 %v1077_v44, %v1077_v44  ;;  %v1082_v49 = vadd.f32 %v230_v47, %v107_v30 }
  0xa7   :  { %v361_v50 = vadd.f32 %v360_v45, %v351_v42  ;;  %v250_v51 = vpop.f32.mrf.mxu2  ;;  %v336_v52 = vadd.f32 %v335_v46, %v1077_v44  ;;  %v270_v57 = vpop.f32.mrf.mxu3  ;;  %v740_v42 = vmov 2  }
  0xa8   :  { %v353_v54 = vmul.f32 %v1082_v49, %v1082_v49  ;;  %v1087_v55 = vadd.f32 %v250_v51, %v107_v30  ;;  %v1093_v61 = vadd.f32 %v270_v57, %v107_v30  ;;  %690 = vset.pattern.permute.xlu0 %v740_v42 }
  0xa9   :  { %v362_v53 = vadd.f32 %v361_v50, %v352_v48  ;;  %v337_v56 = vadd.f32 %v336_v52, %v1082_v49 }
  0xaa   :  { %v354_v59 = vmul.f32 %v1087_v55, %v1087_v55  ;;  %v355_v3 = vmul.f32 %v1093_v61, %v1093_v61 }
  0xab   :  { %v363_v58 = vadd.f32 %v362_v53, %v353_v54  ;;  %v338_v60 = vadd.f32 %v337_v56, %v1087_v55 }
  0xad   :  { %v364_v63 = vadd.f32 %v363_v58, %v354_v59  ;;  %v339_v2 = vadd.f32 %v338_v60, %v1093_v61 }
  0xaf   :  { %v365_v7 = vadd.f32 %v364_v63, %v355_v3 }
  0xb1   :  { %v290_v62 = vpop.f32.mrf.mxu0 }
  0xb2   :  { %v1095_v0 = vadd.f32 %v290_v62, %v107_v30  ;;  %v310_v1 = vpop.f32.mrf.mxu1 }
  0xb3   :  { %v1103_v6 = vadd.f32 %v310_v1, %v107_v30 }
  0xb4   :  { %v356_v4 = vmul.f32 %v1095_v0, %v1095_v0  ;;  %v340_v5 = vadd.f32 %v339_v2, %v1095_v0 }
  0xb5   :  { %v357_v12 = vmul.f32 %v1103_v6, %v1103_v6 }
  0xb6   :  { %v366_v9 = vadd.f32 %v365_v7, %v356_v4  ;;  %v341_v11 = vadd.f32 %v340_v5, %v1103_v6 }
  0xb8   :  { %v330_v8 = vpop.f32.mrf.mxu2  ;;  %v367_v17 = vadd.f32 %v366_v9, %v357_v12 }
  0xb9   :  { %v1105_v10 = vadd.f32 %v330_v8, %v107_v30 }
  0xbb   :  { %v343_v14 = vsel %vm1475_vm1, %v1105_v10, 0.0  ;;  %v358_v15 = vmul.f32 %v1105_v10, %v1105_v10 }
  0xbc   :  { %v344_v16 = vadd.f32 %v343_v14, %v341_v11 }
  0xbd   :  { %v368_v18 = vsel %vm1475_vm1, %v358_v15, 0.0 }
  0xbe   :  { %345 = vadd.xlane.f32.xlu0 %v344_v16  ;;  %v369_v19 = vadd.f32 %v368_v18, %v367_v17 }
  0xc0   :  { %370 = vadd.xlane.f32.xlu1 %v369_v19 }
 0x131   :  { %v346_v21 = vpop.xlane.xlu0 %345 }
 0x132   :  { %v347_v22 = vmul.f32 0.00074074074, %v346_v21 }
 0x133   :  { %v371_v23 = vpop.xlane.xlu1 %370 }
 0x134   :  { %v373_v24 = vmul.f32 %v347_v22, %v347_v22  ;;  %v372_v25 = vmul.f32 0.00074074074, %v371_v23 }
 0x136   :  { %v374_v26 = vsub.f32 %v372_v25, %v373_v24 }
 0x138   :  { %v375_v27 = vmax.f32 %v374_v26, 0.0 }
 0x13a   :  { %v376_v28 = vadd.f32 1e-05, %v375_v27 }
 0x13c   :  { %691 = vrsqrt.f32 %v376_v28  ;;  %vm383_vm3 = vweird.f32 %v376_v28 }
 0x142   :  { %v692_v29 = vpop.eup %691 }
 0x143   :  { %v378_v30 = vmul.f32 %v692_v29, %v376_v28  ;;  %vm384_vm2 = vweird.f32 %v692_v29 }
 0x144   :  { %vm385_vm4 = vmor %vm383_vm3, %vm384_vm2 }
 0x145   :  { %v379_v31 = vmul.f32 %v692_v29, %v378_v30 }
 0x147   :  { %v380_v36 = vmul.f32 0.5, %v379_v31 }
 0x149   :  { %v381_v37 = vsub.f32 1.5, %v380_v36 }
 0x14b   :  { %v382_v38 = vmul.f32 %v692_v29, %v381_v37 }
 0x14d   :  { %v386_v39 = vsel %vm385_vm4, %v692_v29, %v382_v38 }
 0x14e   :  { %v387_v40 = vmul.f32 %v386_v39, %v1013_v13 }
 0x150   :  { %396 = vperm.xlu2 %688, %v387_v40   ;;  %v388_v41 = vmul.f32 %v387_v40, %v347_v22 }
 0x152   :  { %390 = vrot.lane.b32.xlu1 %v388_v41, %s739_s1 }
 0x158   :  { %689 = vset.pattern.permute.xlu2 %v740_v42 }
 0x1aa   :  { %v397_v46 = vpop.permute.xlu2 %396 }
 0x1ab   :  { %v399_v47 = vmul.f32 %v397_v46, %v1058_v32  ;;  %v400_v48 = vmul.f32 %v397_v46, %v1060_v33  ;;  %v401_v50 = vmul.f32 %v397_v46, %v1062_v34  ;;  %v402_v51 = vmul.f32 %v397_v46, %v1064_v35 }
 0x1ac   :  { %v403_v52 = vmul.f32 %v397_v46, %v1077_v44  ;;  %v404_v53 = vmul.f32 %v397_v46, %v1082_v49  ;;  %v405_v32 = vmul.f32 %v397_v46, %v1087_v55  ;;  %v406_v34 = vmul.f32 %v397_v46, %v1093_v61 }
 0x1ad   :  { %v407_v35 = vmul.f32 %v397_v46, %v1095_v0  ;;  %v408_v55 = vmul.f32 %v397_v46, %v1103_v6  ;;  %v409_v8 = vmul.f32 %v397_v46, %v1105_v10 }
 0x1c4   :  { %v391_v43 = vpop.permute.xlu1 %390 }
 0x1c5   :  { %v393_v45 = vsub.f32 %v1013_v13, %v391_v43 }
 0x1c7   :  { %412 = vperm.xlu2 %689, %v393_v45  }
 0x221   :  { %v413_v54 = vpop.permute.xlu2 %412 }
 0x222   :  { %v1123_v56 = vadd.f32 %v413_v54, %v399_v47  ;;  %v1125_v57 = vadd.f32 %v413_v54, %v400_v48  ;;  %v1127_v13 = vadd.f32 %v413_v54, %v401_v50  ;;  %v1129_v58 = vadd.f32 %v413_v54, %v402_v51 }
 0x223   :  { %v1132_v33 = vadd.f32 %v413_v54, %v403_v52  ;;  %v1136_v44 = vadd.f32 %v413_v54, %v404_v53  ;;  %v1139_v59 = vadd.f32 %v413_v54, %v405_v32  ;;  %v1145_v1 = vadd.f32 %v413_v54, %v406_v34 }
 0x224   :  { %v672_v49 = vmul.f32 -1.442695, %v1123_v56  ;;  %v673_v60 = vmul.f32 -1.442695, %v1125_v57  ;;  %v674_v62 = vmul.f32 -1.442695, %v1127_v13  ;;  %v1148_v0 = vadd.f32 %v413_v54, %v407_v35 }
 0x225   :  { %v675_v63 = vmul.f32 -1.442695, %v1129_v58  ;;  %v676_v61 = vmul.f32 -1.442695, %v1132_v33  ;;  %v1150_v2 = vadd.f32 %v413_v54, %v408_v55  ;;  %v677_v3 = vmul.f32 -1.442695, %v1136_v44 }
 0x226   :  { %693 = vpow2.f32 %v672_v49  ;;  %v678_v4 = vmul.f32 -1.442695, %v1139_v59  ;;  %v679_v5 = vmul.f32 -1.442695, %v1145_v1  ;;  %v680_v6 = vmul.f32 -1.442695, %v1148_v0 }
 0x227   :  { %695 = vpow2.f32 %v673_v60  ;;  %v681_v9 = vmul.f32 -1.442695, %v1150_v2  ;;  %v1160_v15 = vadd.f32 %v413_v54, %v409_v8 }
 0x228   :  { %697 = vpow2.f32 %v674_v62 }
 0x229   :  { %699 = vpow2.f32 %v675_v63  ;;  %v682_v21 = vmul.f32 -1.442695, %v1160_v15 }
 0x22a   :  { %701 = vpow2.f32 %v676_v61 }
 0x22b   :  { %703 = vpow2.f32 %v677_v3 }
 0x22c   :  { %v694_v7 = vpop.eup %693  ;;  %705 = vpow2.f32 %v678_v4 }
 0x22d   :  { %v696_v11 = vpop.eup %695  ;;  %v1158_v12 = vadd.f32 1.0, %v694_v7  ;;  %707 = vpow2.f32 %v679_v5 }
 0x22e   :  { %v698_v14 = vpop.eup %697  ;;  %v1162_v16 = vadd.f32 1.0, %v696_v11  ;;  %709 = vpow2.f32 %v680_v6 }
 0x22f   :  { %v700_v17 = vpop.eup %699  ;;  %v1164_v18 = vadd.f32 1.0, %v698_v14  ;;  %711 = vpow2.f32 %v681_v9  ;;  %v481_v28 = vand.u32 2147483648, %v1158_v12  ;;  %v479_v37 = vand.u32 2147483647, %v1158_v12 }
 0x230   :  { %v702_v19 = vpop.eup %701  ;;  %v1166_v10 = vadd.f32 1.0, %v700_v17  ;;  %713 = vrcp.f32 %v1158_v12  ;;  %v496_v30 = vand.u32 2147483648, %v1162_v16  ;;  %v494_v38 = vand.u32 2147483647, %v1162_v16 }
 0x231   :  { %v704_v20 = vpop.eup %703  ;;  %715 = vrcp.f32 %v1162_v16  ;;  %v1171_v23 = vadd.f32 1.0, %v702_v19  ;;  %v511_v42 = vand.u32 2147483648, %v1164_v18  ;;  %vm475_vm5 = vweird.f32 %v1158_v12 }
 0x232   :  { %v706_v22 = vpop.eup %705  ;;  %717 = vrcp.f32 %v1164_v18  ;;  %v1174_v26 = vadd.f32 1.0, %v704_v20  ;;  %v1199_v46 = vor.u32 1.1754944e-38, %v481_v28  ;;  %vm490_vm6 = vweird.f32 %v1162_v16 }
 0x233   :  { %v708_v24 = vpop.eup %707  ;;  %719 = vrcp.f32 %v1166_v10  ;;  %v1190_v40 = vadd.f32 1.0, %v706_v22  ;;  %v1208_v52 = vor.u32 1.1754944e-38, %v496_v30  ;;  %v509_v53 = vand.u32 2147483647, %v1164_v18 }
 0x234   :  { %v710_v25 = vpop.eup %709  ;;  %721 = vpow2.f32 %v682_v21  ;;  %v1196_v43 = vadd.f32 1.0, %v708_v24  ;;  %vm505_vm7 = vweird.f32 %v1164_v18  ;;  %v524_v49 = vand.u32 2147483647, %v1166_v10 }
 0x235   :  { %v712_v27 = vpop.eup %711  ;;  %723 = vrcp.f32 %v1171_v23  ;;  %v1205_v50 = vadd.f32 1.0, %v710_v25  ;;  %v1221_v55 = vor.u32 1.1754944e-38, %v511_v42  ;;  %vm520_vm8 = vweird.f32 %v1166_v10 }
 0x236   :  { %v1178_v29 = vpop.eup %713  ;;  %725 = vrcp.f32 %v1174_v26  ;;  %v1211_v32 = vadd.f32 1.0, %v712_v27  ;;  %v526_v4 = vand.u32 2147483648, %v1166_v10  ;;  %v539_v8 = vand.u32 2147483647, %v1171_v23 }
 0x237   :  { %v1182_v31 = vpop.eup %715  ;;  %v471_v36 = vmul.f32 %v1178_v29, %v1158_v12  ;;  %727 = vrcp.f32 %v1190_v40  ;;  %vm476_vm9 = vweird.f32 %v1178_v29  ;;  %v541_v9 = vand.u32 2147483648, %v1171_v23 }
 0x238   :  { %v1188_v39 = vpop.eup %717  ;;  %v486_v41 = vmul.f32 %v1182_v31, %v1162_v16  ;;  %vm1236_vm10 = vcmp.eq.f32.partialorder %v479_v37, 8.507059e+37  ;;  %vm491_vm11 = vweird.f32 %v1182_v31  ;;  %vm1241_vm12 = vcmp.eq.f32.partialorder %v494_v38, 8.507059e+37  ;;  %vm1270_vm2 = vmor %vm475_vm5, %vm476_vm9 }
 0x239   :  { %v472_v45 = vsub.f32 1.0, %v471_v36  ;;  %v501_v47 = vmul.f32 %v1188_v39, %v1164_v18  ;;  %v1203_v48 = vpop.eup %719  ;;  %vm1245_vm13 = vcmp.eq.f32.partialorder %v509_v53, 8.507059e+37  ;;  %vm535_vm14 = vweird.f32 %v1171_v23  ;;  %vm1280_vm1 = vmor %vm490_vm6, %vm491_vm11 }
 0x23a   :  { %v487_v51 = vsub.f32 1.0, %v486_v41  ;;  %v722_v54 = vpop.eup %721  ;;  %v516_v35 = vmul.f32 %v1203_v48, %v1166_v10  ;;  %v556_v21 = vand.u32 2147483648, %v1174_v26  ;;  %v554_v27 = vand.u32 2147483647, %v1174_v26 }
 0x23b   :  { %v502_v34 = vsub.f32 1.0, %v501_v47  ;;  %v1217_v60 = vpop.eup %723  ;;  %v473_v62 = vmul.f32 %v1178_v29, %v472_v45  ;;  %v1231_v7 = vadd.f32 1.0, %v722_v54  ;;  %vm506_vm15 = vweird.f32 %v1188_v39 }
 0x23c   :  { %v488_v63 = vmul.f32 %v1182_v31, %v487_v51  ;;  %v517_v3 = vsub.f32 1.0, %v516_v35  ;;  %v531_v5 = vmul.f32 %v1217_v60, %v1171_v23  ;;  %v1229_v6 = vpop.eup %725  ;;  %vm1259_vm0 = vcmp.eq.f32.partialorder %v524_v49, 8.507059e+37  ;;  %vm1302_vm6 = vmor %vm505_vm7, %vm506_vm15 }
 0x23d   :  { %v503_v61 = vmul.f32 %v1188_v39, %v502_v34  ;;  %v474_v22 = vadd.f32 %v1178_v29, %v473_v62  ;;  %v546_v25 = vmul.f32 %v1229_v6, %v1174_v26  ;;  %v527_v36 = vor.u32 1.1754944e-38, %v526_v4  ;;  %v1264_v38 = vpop.eup %727 }
 0x23e   :  { %v518_v19 = vmul.f32 %v1203_v48, %v517_v3  ;;  %v532_v20 = vsub.f32 1.0, %v531_v5  ;;  %v489_v24 = vadd.f32 %v1182_v31, %v488_v63  ;;  %vm521_vm3 = vweird.f32 %v1203_v48 }
 0x23f   :  { %v504_v28 = vadd.f32 %v1188_v39, %v503_v61  ;;  %v542_v42 = vor.u32 1.1754944e-38, %v541_v9  ;;  %v547_v45 = vsub.f32 1.0, %v546_v25  ;;  %vm550_vm4 = vweird.f32 %v1174_v26 }
 0x240   :  { %v533_v37 = vmul.f32 %v1217_v60, %v532_v20  ;;  %v519_v12 = vadd.f32 %v1203_v48, %v518_v19  ;;  %vm536_vm5 = vweird.f32 %v1217_v60  ;;  %vm1286_vm9 = vcmp.eq.f32.partialorder %v539_v8, 8.507059e+37 }
 0x241   :  { %v557_v53 = vor.u32 1.1754944e-38, %v556_v21  ;;  %v561_v54 = vmul.f32 %v1264_v38, %v1190_v40  ;;  %v478_v16 = vsel %vm1270_vm2, %v1178_v29, %v474_v22  ;;  %v493_v34 = vsel %vm1280_vm1, %v1182_v31, %v489_v24  ;;  %vm1321_vm1 = vmor %vm520_vm8, %vm521_vm3 }
 0x242   :  { %v548_v49 = vmul.f32 %v1229_v6, %v547_v45  ;;  %vm1307_vm11 = vcmp.eq.f32.partialorder %v554_v27, 8.507059e+37  ;;  %vm565_vm2 = vweird.f32 %v1190_v40  ;;  %v508_v29 = vsel %vm1302_vm6, %v1188_v39, %v504_v28  ;;  %vm1348_vm8 = vmor %vm535_vm14, %vm536_vm5 }
 0x243   :  { %v534_v31 = vadd.f32 %v1217_v60, %v533_v37  ;;  %v562_v63 = vsub.f32 1.0, %v561_v54  ;;  %729 = vrcp.f32 %v1196_v43  ;;  %vm551_vm7 = vweird.f32 %v1229_v6 }
 0x244   :  { %v549_v61 = vadd.f32 %v1229_v6, %v548_v49  ;;  %v569_v3 = vand.u32 2147483647, %v1190_v40  ;;  %v571_v39 = vand.u32 2147483648, %v1190_v40  ;;  %v523_v4 = vsel %vm1321_vm1, %v1203_v48, %v519_v12 }
 0x245   :  { %v563_v5 = vmul.f32 %v1264_v38, %v562_v63  ;;  %vm566_vm15 = vweird.f32 %v1264_v38  ;;  %731 = vrcp.f32 %v1205_v50  ;;  %v483_v10 = vsel %vm1236_vm10, %v1199_v46, %v478_v16  ;;  %vm1358_vm10 = vmor %vm550_vm4, %vm551_vm7 }
 0x246   :  { %v498_v8 = vsel %vm1241_vm12, %v1208_v52, %v493_v34  ;;  %v513_v9 = vsel %vm1245_vm13, %v1221_v55, %v508_v29  ;;  %v584_v19 = vand.u32 2147483647, %v1196_v43  ;;  %v538_v46 = vsel %vm1348_vm8, %v1217_v60, %v534_v31  ;;  %vm1372_vm12 = vmor %vm565_vm2, %vm566_vm15 }
 0x247   :  { %v564_v55 = vadd.f32 %v1264_v38, %v563_v5  ;;  %v586_v23 = vand.u32 2147483648, %v1196_v43  ;;  %733 = vrcp.f32 %v1211_v32  ;;  %v528_v11 = vsel %vm1259_vm0, %v527_v36, %v523_v4 }
 0x248   :  { %v553_v14 = vsel %vm1358_vm10, %v1229_v6, %v549_v61  ;;  %vm1376_vm13 = vcmp.eq.f32.partialorder %v569_v3, 8.507059e+37  ;;  %v572_v17 = vor.u32 1.1754944e-38, %v571_v39  ;;  %vm580_vm14 = vweird.f32 %v1196_v43 }
 0x249   :  { %v730_v20 = vpop.eup %729  ;;  %v568_v21 = vsel %vm1372_vm12, %v1264_v38, %v564_v55  ;;  %v599_v6 = vand.u32 2147483647, %v1205_v50  ;;  %735 = vrcp.f32 %v1231_v7  ;;  %v543_v40 = vsel %vm1286_vm9, %v542_v42, %v538_v46 }
 0x24a   :  { %v576_v22 = vmul.f32 %v730_v20, %v1196_v43  ;;  %vm1389_vm0 = vcmp.eq.f32.partialorder %v584_v19, 8.507059e+37  ;;  %vm595_vm3 = vweird.f32 %v1205_v50  ;;  %v558_v27 = vsel %vm1307_vm11, %v557_v53, %v553_v14 }
 0x24b   :  { %v732_v25 = vpop.eup %731  ;;  %v587_v28 = vor.u32 1.1754944e-38, %v586_v23  ;;  %v601_v30 = vand.u32 2147483648, %v1205_v50  ;;  %v635_v36 = vmul.f32 %v483_v10, %v1123_v56  ;;  %v573_v37 = vsel %vm1376_vm13, %v572_v17, %v568_v21 }
 0x24c   :  { %v577_v38 = vsub.f32 1.0, %v576_v22  ;;  %v591_v41 = vmul.f32 %v732_v25, %v1205_v50  ;;  %v636_v42 = vmul.f32 %v498_v8, %v1125_v57  ;;  %vm1402_vm4 = vcmp.eq.f32.partialorder %v599_v6, 8.507059e+37 }
 0x24d   :  { %v734_v45 = vpop.eup %733  ;;  %v637_v12 = vmul.f32 %v513_v9, %v1127_v13  ;;  %v638_v51 = vmul.f32 %v528_v11, %v1129_v58  ;;  %v639_v53 = vmul.f32 %v543_v40, %v1132_v33  ;;  %646 = vst [vmem:[%s1474_s3] sm:$0xff] %v635_v36  ;;  %vm581_vm5 = vweird.f32 %v730_v20 }
 0x24e   :  { %v578_v56 = vmul.f32 %v730_v20, %v577_v38  ;;  %v592_v54 = vsub.f32 1.0, %v591_v41  ;;  %v606_v57 = vmul.f32 %v734_v45, %v1211_v32  ;;  %647 = vst [vmem:[%s1474_s3 + $0x8] sm:$0xff] %v636_v42  ;;  %vm596_vm9 = vweird.f32 %v732_v25  ;;  %vm582_vm6 = vmor %vm580_vm14, %vm581_vm5 }
 0x24f   :  { %v736_v16 = vpop.eup %735  ;;  %v602_v13 = vor.u32 1.1754944e-38, %v601_v30  ;;  %v640_v58 = vmul.f32 %v558_v27, %v1136_v44  ;;  %v641_v33 = vmul.f32 %v573_v37, %v1139_v59  ;;  %648 = vst [vmem:[%s1474_s3 + $0x10] sm:$0xff] %v637_v12  ;;  %vm610_vm11 = vweird.f32 %v1211_v32  ;;  %vm597_vm1 = vmor %vm595_vm3, %vm596_vm9 }
 0x250   :  { %v579_v34 = vadd.f32 %v730_v20, %v578_v56  ;;  %v593_v35 = vmul.f32 %v732_v25, %v592_v54  ;;  %v607_v49 = vsub.f32 1.0, %v606_v57  ;;  %v621_v62 = vmul.f32 %v736_v16, %v1231_v7  ;;  %649 = vst [vmem:[%s1474_s3 + $0x18] sm:$0xff] %v638_v51 }
 0x251   :  { %vm611_vm2 = vweird.f32 %v734_v45  ;;  %v614_v44 = vand.u32 2147483647, %v1211_v32  ;;  %v616_v59 = vand.u32 2147483648, %v1211_v32  ;;  %650 = vst [vmem:[%s1474_s3 + $0x20] sm:$0xff] %v639_v53  ;;  %vm626_vm7 = vweird.f32 %v736_v16 }
 0x252   :  { %v583_v29 = vsel %vm582_vm6, %v730_v20, %v579_v34  ;;  %v594_v31 = vadd.f32 %v732_v25, %v593_v35  ;;  %v608_v63 = vmul.f32 %v734_v45, %v607_v49  ;;  %v622_v18 = vsub.f32 1.0, %v621_v62  ;;  %651 = vst [vmem:[%s1474_s3 + $0x28] sm:$0xff] %v640_v58  ;;  %vm612_vm15 = vmor %vm610_vm11, %vm611_vm2 }
 0x253   :  { %v588_v43 = vsel %vm1389_vm0, %v587_v28, %v583_v29  ;;  %v629_v61 = vand.u32 2147483647, %v1231_v7  ;;  %v631_v3 = vand.u32 2147483648, %v1231_v7  ;;  %652 = vst [vmem:[%s1474_s3 + $0x30] sm:$0xff] %v641_v33  ;;  %v617_v50 = vor.u32 1.1754944e-38, %v616_v59 }
 0x254   :  { %v598_v39 = vsel %vm597_vm1, %v732_v25, %v594_v31  ;;  %v609_v4 = vadd.f32 %v734_v45, %v608_v63  ;;  %v623_v5 = vmul.f32 %v736_v16, %v622_v18  ;;  %v642_v10 = vmul.f32 %v588_v43, %v1145_v1 }
 0x255   :  { %v603_v8 = vsel %vm1402_vm4, %v602_v13, %v598_v39  ;;  %vm625_vm8 = vweird.f32 %v1231_v7  ;;  %vm615_vm10 = vcmp.eq.f32.partialorder %v614_v44, 8.507059e+37  ;;  %v632_v46 = vor.u32 1.1754944e-38, %v631_v3 }
 0x256   :  { %v613_v9 = vsel %vm612_vm15, %v734_v45, %v609_v4  ;;  %v624_v48 = vadd.f32 %v736_v16, %v623_v5  ;;  %v643_v19 = vmul.f32 %v603_v8, %v1148_v0  ;;  %653 = vst [vmem:[%s1474_s3 + $0x38] sm:$0xff] %v642_v10  ;;  %vm627_vm12 = vmor %vm625_vm8, %vm626_vm7  ;;  %vm630_vm13 = vcmp.eq.f32.partialorder %v629_v61, 8.507059e+37 }
 0x257   :  { %v618_v1 = vsel %vm615_vm10, %v617_v50, %v613_v9  ;;  %vm1508_vm14 = vcmask 572416  }
 0x258   :  { %v628_v52 = vsel %vm627_vm12, %v736_v16, %v624_v48  ;;  %v644_v32 = vmul.f32 %v618_v1, %v1150_v2  ;;  %654 = vst [vmem:[%s1474_s3 + $0x40] sm:$0xff] %v643_v19 }
 0x259   :  { %v633_v7 = vsel %vm630_vm13, %v632_v46, %v628_v52 }
 0x25a   :  { %v645_v55 = vmul.f32 %v633_v7, %v1160_v15  ;;  %655 = vst [vmem:[%s1474_s3 + $0x48] sm:$0xff] %v644_v32 }
 0x25c   :  { %656 = vst.msk [vmem:[%s1474_s3 + $0x50] sm:$0xff] %vm1508_vm14, %v645_v55 }

// kernel: encoder_forward.5
= control target key start
LH: loop header
LB: loop body
LE: loop exit
PB: predicated region body
PF: predicated region fallthrough
CT: control target
= control target key end

     0   :  { %v439_v51 = vmov 0   ;;  %vm146_vm0 = vcmask 310272   ;;  %s725_s1 = inlined_call_operand.vmem [shape: f32[128,294], index: 1, kind: input, shape index: {}]   ;;  %s726_s2 = inlined_call_operand.vmem [shape: f32[16,128], index: 2, kind: input, shape index: {}]   ;;  %s727_s0 = inlined_call_operand.vmem [shape: f32[16,3], index: 0, kind: input, shape index: {}]   ;;  %s728_s3 = inlined_call_operand.vmem [shape: f32[16,294], index: 3, kind: output, shape index: {}]  }
   0x1   :  { %v61_v0 = vld [vmem:[%s725_s1 + $0x168] sm:$0xff]  ;;  %v62_v1 = vld [vmem:[%s725_s1 + $0x170] sm:$0xff]  ;;  %v63_v2 = vld [vmem:[%s725_s1 + $0x178] sm:$0xff]  ;;  %406 = vset.pattern.permute.xlu0 %v439_v51 }
   0x2   :  { %386 = vmatpush.msra.mxu3 %v61_v0  ;;  %99 = vmatpush.msra.mxu1 %v62_v1  ;;  %v58_v3 = vld [vmem:[%s725_s1 + $0x150] sm:$0xff]  ;;  %v59_v4 = vld [vmem:[%s725_s1 + $0x158] sm:$0xff]  ;;  %v60_v5 = vld [vmem:[%s725_s1 + $0x160] sm:$0xff] }
   0x3   :  { %122 = vmatpush.msra.mxu2 %v63_v2  ;;  %v55_v6 = vld [vmem:[%s725_s1 + $0x138] sm:$0xff]  ;;  %v56_v7 = vld [vmem:[%s725_s1 + $0x140] sm:$0xff]  ;;  %76 = vmatpush.msra.mxu0 %v61_v0  ;;  %v57_v8 = vld [vmem:[%s725_s1 + $0x148] sm:$0xff] }
   0x4   :  { %387 = vmatpush.msra.mxu3 %v58_v3  ;;  %100 = vmatpush.msra.mxu1 %v59_v4  ;;  %v52_v9 = vld [vmem:[%s725_s1 + $0x120] sm:$0xff]  ;;  %v53_v10 = vld [vmem:[%s725_s1 + $0x128] sm:$0xff]  ;;  %v54_v11 = vld [vmem:[%s725_s1 + $0x130] sm:$0xff] }
   0x5   :  { %123 = vmatpush.msra.mxu2 %v60_v5  ;;  %77 = vmatpush.msra.mxu0 %v58_v3  ;;  %v49_v12 = vld [vmem:[%s725_s1 + $0x108] sm:$0xff]  ;;  %v50_v13 = vld [vmem:[%s725_s1 + $0x110] sm:$0xff]  ;;  %v51_v14 = vld [vmem:[%s725_s1 + $0x118] sm:$0xff] }
   0x6   :  { %388 = vmatpush.msra.mxu3 %v55_v6  ;;  %101 = vmatpush.msra.mxu1 %v56_v7  ;;  %v46_v15 = vld [vmem:[%s725_s1 + $0xf0] sm:$0xff]  ;;  %v47_v16 = vld [vmem:[%s725_s1 + $0xf8] sm:$0xff]  ;;  %v48_v17 = vld [vmem:[%s725_s1 + $0x100] sm:$0xff] }
   0x7   :  { %124 = vmatpush.msra.mxu2 %v57_v8  ;;  %78 = vmatpush.msra.mxu0 %v55_v6  ;;  %v43_v18 = vld [vmem:[%s725_s1 + $0xd8] sm:$0xff]  ;;  %v44_v19 = vld [vmem:[%s725_s1 + $0xe0] sm:$0xff]  ;;  %v45_v20 = vld [vmem:[%s725_s1 + $0xe8] sm:$0xff] }
   0x8   :  { %389 = vmatpush.msra.mxu3 %v52_v9  ;;  %102 = vmatpush.msra.mxu1 %v53_v10  ;;  %v40_v21 = vld [vmem:[%s725_s1 + $0xc0] sm:$0xff]  ;;  %v41_v22 = vld [vmem:[%s725_s1 + $0xc8] sm:$0xff]  ;;  %v42_v23 = vld [vmem:[%s725_s1 + $0xd0] sm:$0xff] }
   0x9   :  { %125 = vmatpush.msra.mxu2 %v54_v11  ;;  %79 = vmatpush.msra.mxu0 %v52_v9  ;;  %v37_v24 = vld [vmem:[%s725_s1 + $0xa8] sm:$0xff]  ;;  %v38_v25 = vld [vmem:[%s725_s1 + $0xb0] sm:$0xff]  ;;  %v39_v26 = vld [vmem:[%s725_s1 + $0xb8] sm:$0xff] }
   0xa   :  { %390 = vmatpush.msra.mxu3 %v49_v12  ;;  %103 = vmatpush.msra.mxu1 %v50_v13  ;;  %v34_v27 = vld [vmem:[%s725_s1 + $0x90] sm:$0xff]  ;;  %v35_v28 = vld [vmem:[%s725_s1 + $0x98] sm:$0xff]  ;;  %v36_v29 = vld [vmem:[%s725_s1 + $0xa0] sm:$0xff] }
   0xb   :  { %126 = vmatpush.msra.mxu2 %v51_v14  ;;  %80 = vmatpush.msra.mxu0 %v49_v12  ;;  %v31_v30 = vld [vmem:[%s725_s1 + $0x78] sm:$0xff]  ;;  %v32_v31 = vld [vmem:[%s725_s1 + $0x80] sm:$0xff]  ;;  %v33_v32 = vld [vmem:[%s725_s1 + $0x88] sm:$0xff] }
   0xc   :  { %391 = vmatpush.msra.mxu3 %v46_v15  ;;  %104 = vmatpush.msra.mxu1 %v47_v16  ;;  %v28_v33 = vld [vmem:[%s725_s1 + $0x60] sm:$0xff]  ;;  %v29_v34 = vld [vmem:[%s725_s1 + $0x68] sm:$0xff]  ;;  %v30_v35 = vld [vmem:[%s725_s1 + $0x70] sm:$0xff] }
   0xd   :  { %127 = vmatpush.msra.mxu2 %v48_v17  ;;  %81 = vmatpush.msra.mxu0 %v46_v15  ;;  %v25_v36 = vld [vmem:[%s725_s1 + $0x48] sm:$0xff]  ;;  %v26_v37 = vld [vmem:[%s725_s1 + $0x50] sm:$0xff]  ;;  %v27_v38 = vld [vmem:[%s725_s1 + $0x58] sm:$0xff] }
   0xe   :  { %392 = vmatpush.msra.mxu3 %v43_v18  ;;  %105 = vmatpush.msra.mxu1 %v44_v19  ;;  %v22_v39 = vld [vmem:[%s725_s1 + $0x30] sm:$0xff]  ;;  %v23_v40 = vld [vmem:[%s725_s1 + $0x38] sm:$0xff]  ;;  %v24_v41 = vld [vmem:[%s725_s1 + $0x40] sm:$0xff] }
   0xf   :  { %128 = vmatpush.msra.mxu2 %v45_v20  ;;  %82 = vmatpush.msra.mxu0 %v43_v18  ;;  %v19_v42 = vld [vmem:[%s725_s1 + $0x18] sm:$0xff]  ;;  %v20_v43 = vld [vmem:[%s725_s1 + $0x20] sm:$0xff]  ;;  %v21_v44 = vld [vmem:[%s725_s1 + $0x28] sm:$0xff] }
  0x10   :  { %393 = vmatpush.msra.mxu3 %v40_v21  ;;  %106 = vmatpush.msra.mxu1 %v41_v22  ;;  %v16_v45 = vld [vmem:[%s725_s1] sm:$0xff]  ;;  %v17_v46 = vld [vmem:[%s725_s1 + $0x8] sm:$0xff]  ;;  %v18_v47 = vld [vmem:[%s725_s1 + $0x10] sm:$0xff] }
  0x11   :  { %129 = vmatpush.msra.mxu2 %v42_v23  ;;  %83 = vmatpush.msra.mxu0 %v40_v21  ;;  %v15_v48 = vld [vmem:[%s726_s2 + $0x8] sm:$0xff]  ;;  %v14_v49 = vld [vmem:[%s726_s2] sm:$0xff]  ;;  %v440_v21 = vmov 1  }
  0x12   :  { %394 = vmatpush.msra.mxu3 %v37_v24  ;;  %107 = vmatpush.msra.mxu1 %v38_v25  ;;  %v616_v50 = vld [vmem:[%s727_s0] sm:$0xff]  ;;  %v622_v52 = vld [vmem:[%s727_s0 + $0x8] sm:$0xff]  ;;  %s441_s0 = smov 1  }
  0x13   :  { %130 = vmatpush.msra.mxu2 %v39_v26  ;;  %84 = vmatpush.msra.mxu0 %v37_v24 }
  0x14   :  { %395 = vmatpush.msra.mxu3 %v34_v27  ;;  %108 = vmatpush.msra.mxu1 %v35_v28 }
  0x15   :  { %131 = vmatpush.msra.mxu2 %v36_v29  ;;  %85 = vmatpush.msra.mxu0 %v34_v27 }
  0x16   :  { %396 = vmatpush.msra.mxu3 %v31_v30  ;;  %109 = vmatpush.msra.mxu1 %v32_v31 }
  0x17   :  { %132 = vmatpush.msra.mxu2 %v33_v32  ;;  %86 = vmatpush.msra.mxu0 %v31_v30 }
  0x18   :  { %397 = vmatpush.msra.mxu3 %v28_v33  ;;  %110 = vmatpush.msra.mxu1 %v29_v34 }
  0x19   :  { %133 = vmatpush.msra.mxu2 %v30_v35  ;;  %87 = vmatpush.msra.mxu0 %v28_v33 }
  0x1a   :  { %398 = vmatpush.msra.mxu3 %v25_v36  ;;  %111 = vmatpush.msra.mxu1 %v26_v37 }
  0x1b   :  { %134 = vmatpush.msra.mxu2 %v27_v38  ;;  %88 = vmatpush.msra.mxu0 %v25_v36 }
  0x1c   :  { %399 = vmatpush.msra.mxu3 %v22_v39  ;;  %112 = vmatpush.msra.mxu1 %v23_v40 }
  0x1d   :  { %135 = vmatpush.msra.mxu2 %v24_v41  ;;  %89 = vmatpush.msra.mxu0 %v22_v39 }
  0x1e   :  { %400 = vmatpush.msra.mxu3 %v19_v42  ;;  %113 = vmatpush.msra.mxu1 %v20_v43 }
  0x1f   :  { %136 = vmatpush.msra.mxu2 %v21_v44  ;;  %90 = vmatpush.msra.mxu0 %v19_v42 }
  0x20   :  { %401 = vmatpush.msra.mxu3 %v16_v45  ;;  %114 = vmatpush.msra.mxu1 %v17_v46 }
  0x21   :  { %137 = vmatpush.msra.mxu2 %v18_v47  ;;  %95 = vmatmul.f32.vlgmr.msra.gmra.mxu3 %v15_v48 }
  0x22   :  { %115 = vmatmul.f32.vlgmr.msra.gmra.mxu1 %v14_v49  ;;  %138 = vmatmul.f32.vlgmr.msra.gmra.mxu2 %v14_v49 }
  0x23   :  { %91 = vmatpush.msra.mxu0 %v16_v45  ;;  %68 = vperm.xlu0 %406, %v616_v50  }
  0x24   :  { %92 = vmatmul.f32.vlgmr.msra.gmra.mxu0 %v14_v49  ;;  %407 = vset.pattern.permute.xlu2 %v440_v21 }
  0x2a   :  { %118 = vmatmul.f32.gmra.mxu1 %v15_v48  ;;  %141 = vmatmul.f32.gmra.mxu2 %v15_v48 }
  0x2b   :  { %73 = vperm.xlu0 %406, %v622_v52  }
  0x33   :  { %408 = vset.pattern.permute.xlu0 %v440_v21 }
  0x95   :  { %v69_v53 = vpop.permute.xlu0 %68 }
  0x9d   :  { %v74_v1 = vpop.permute.xlu0 %73 }
  0x9f   :  { %v116_v54 = vpop.f32.mrf.mxu1 }
  0xa0   :  { %v625_v55 = vadd.f32 %v116_v54, %v69_v53 }
  0xa1   :  { %v93_v56 = vpop.f32.mrf.mxu0 }
  0xa2   :  { %v627_v57 = vadd.f32 %v93_v56, %v69_v53  ;;  %v159_v58 = vmul.f32 %v625_v55, %v625_v55 }
  0xa4   :  { %v158_v59 = vmul.f32 %v627_v57, %v627_v57  ;;  %v145_v61 = vadd.f32 %v625_v55, %v627_v57  ;;  %v96_v2 = vpop.f32.mrf.mxu3 }
  0xa5   :  { %v139_v60 = vpop.f32.mrf.mxu2  ;;  %v644_v8 = vadd.f32 %v96_v2, %v74_v1 }
  0xa6   :  { %v635_v62 = vadd.f32 %v139_v60, %v69_v53  ;;  %v164_v0 = vadd.f32 %v159_v58, %v158_v59  ;;  %v442_v60 = vmov 2  }
  0xa7   :  { %v119_v63 = vpop.f32.mrf.mxu1  ;;  %v161_v13 = vmul.f32 %v644_v8, %v644_v8 }
  0xa8   :  { %v147_v3 = vsel %vm146_vm0, %v635_v62, 0.0  ;;  %v160_v4 = vmul.f32 %v635_v62, %v635_v62  ;;  %v641_v5 = vadd.f32 %v119_v63, %v74_v1 }
  0xa9   :  { %v148_v6 = vadd.f32 %v147_v3, %v145_v61 }
  0xaa   :  { %v165_v7 = vsel %vm146_vm0, %v160_v4, 0.0  ;;  %v162_v10 = vmul.f32 %v641_v5, %v641_v5  ;;  %v151_v14 = vadd.f32 %v641_v5, %v644_v8 }
  0xab   :  { %149 = vadd.xlane.f32.xlu1 %v148_v6  ;;  %v166_v9 = vadd.f32 %v165_v7, %v164_v0 }
  0xac   :  { %v169_v18 = vadd.f32 %v162_v10, %v161_v13 }
  0xad   :  { %v142_v11 = vpop.f32.mrf.mxu2  ;;  %167 = vadd.xlane.f32.xlu2 %v166_v9 }
  0xae   :  { %v648_v12 = vadd.f32 %v142_v11, %v74_v1 }
  0xb0   :  { %v152_v15 = vsel %vm146_vm0, %v648_v12, 0.0  ;;  %v163_v16 = vmul.f32 %v648_v12, %v648_v12 }
  0xb1   :  { %v153_v17 = vadd.f32 %v152_v15, %v151_v14 }
  0xb2   :  { %v170_v19 = vsel %vm146_vm0, %v163_v16, 0.0 }
  0xb3   :  { %154 = vadd.xlane.f32.xlu1 %v153_v17  ;;  %v171_v20 = vadd.f32 %v170_v19, %v169_v18 }
  0xb5   :  { %172 = vadd.xlane.f32.xlu2 %v171_v20 }
 0x11e   :  { %v150_v22 = vpop.xlane.xlu1 %149 }
 0x11f   :  { %v156_v23 = vmul.f32 0.0034013605, %v150_v22 }
 0x120   :  { %v168_v24 = vpop.xlane.xlu2 %167 }
 0x121   :  { %v176_v25 = vmul.f32 %v156_v23, %v156_v23  ;;  %v174_v26 = vmul.f32 0.0034013605, %v168_v24 }
 0x123   :  { %v178_v27 = vsub.f32 %v174_v26, %v176_v25 }
 0x125   :  { %v180_v28 = vmax.f32 %v178_v27, 0.0 }
 0x126   :  { %v155_v29 = vpop.xlane.xlu1 %154 }
 0x127   :  { %v182_v30 = vadd.f32 1e-05, %v180_v28  ;;  %v157_v31 = vmul.f32 0.0034013605, %v155_v29 }
 0x128   :  { %v173_v32 = vpop.xlane.xlu2 %172 }
 0x129   :  { %411 = vrsqrt.f32 %v182_v30  ;;  %v177_v33 = vmul.f32 %v157_v31, %v157_v31  ;;  %v175_v34 = vmul.f32 0.0034013605, %v173_v32  ;;  %vm190_vm2 = vweird.f32 %v182_v30 }
 0x12b   :  { %v179_v35 = vsub.f32 %v175_v34, %v177_v33 }
 0x12d   :  { %v181_v36 = vmax.f32 %v179_v35, 0.0 }
 0x12f   :  { %v412_v37 = vpop.eup %411  ;;  %v183_v38 = vadd.f32 1e-05, %v181_v36 }
 0x130   :  { %v185_v39 = vmul.f32 %v412_v37, %v182_v30  ;;  %vm191_vm1 = vweird.f32 %v412_v37 }
 0x131   :  { %413 = vrsqrt.f32 %v183_v38  ;;  %vm192_vm3 = vmor %vm190_vm2, %vm191_vm1  ;;  %vm200_vm5 = vweird.f32 %v183_v38 }
 0x132   :  { %v186_v40 = vmul.f32 %v412_v37, %v185_v39 }
 0x134   :  { %v187_v41 = vmul.f32 0.5, %v186_v40 }
 0x136   :  { %v188_v42 = vsub.f32 1.5, %v187_v41 }
 0x137   :  { %v414_v43 = vpop.eup %413 }
 0x138   :  { %v195_v44 = vmul.f32 %v414_v43, %v183_v38  ;;  %v189_v45 = vmul.f32 %v412_v37, %v188_v42  ;;  %vm201_vm4 = vweird.f32 %v414_v43 }
 0x139   :  { %vm202_vm6 = vmor %vm200_vm5, %vm201_vm4 }
 0x13a   :  { %v196_v46 = vmul.f32 %v414_v43, %v195_v44  ;;  %v193_v47 = vsel %vm192_vm3, %v412_v37, %v189_v45 }
 0x13b   :  { %v204_v48 = vmul.f32 %v193_v47, %v616_v50 }
 0x13c   :  { %v197_v49 = vmul.f32 0.5, %v196_v46 }
 0x13d   :  { %220 = vperm.xlu2 %407, %v204_v48   ;;  %v206_v51 = vmul.f32 %v204_v48, %v156_v23 }
 0x13e   :  { %v198_v53 = vsub.f32 1.5, %v197_v49 }
 0x13f   :  { %210 = vrot.lane.b32.xlu0 %v206_v51, %s441_s0 }
 0x140   :  { %v199_v54 = vmul.f32 %v414_v43, %v198_v53 }
 0x142   :  { %v203_v56 = vsel %vm202_vm6, %v414_v43, %v199_v54 }
 0x143   :  { %v205_v58 = vmul.f32 %v203_v56, %v622_v52 }
 0x145   :  { %v207_v59 = vmul.f32 %v205_v58, %v157_v31  ;;  %410 = vset.pattern.permute.xlu2 %v442_v60 }
 0x147   :  { %225 = vperm.xlu0 %408, %v205_v58   ;;  %212 = vrot.lane.b32.xlu1 %v207_v59, %s441_s0 }
 0x14f   :  { %409 = vset.pattern.permute.xlu0 %v442_v60 }
 0x197   :  { %v221_v2 = vpop.permute.xlu2 %220 }
 0x198   :  { %v228_v18 = vmul.f32 %v221_v2, %v627_v57  ;;  %v229_v19 = vmul.f32 %v221_v2, %v625_v55  ;;  %v230_v20 = vmul.f32 %v221_v2, %v635_v62 }
 0x1b1   :  { %v211_v61 = vpop.permute.xlu0 %210 }
 0x1b2   :  { %v216_v63 = vsub.f32 %v616_v50, %v211_v61 }
 0x1b4   :  { %236 = vperm.xlu0 %409, %v216_v63  }
 0x1b9   :  { %v213_v0 = vpop.permute.xlu1 %212  ;;  %v226_v3 = vpop.permute.xlu0 %225 }
 0x1ba   :  { %v217_v1 = vsub.f32 %v622_v52, %v213_v0  ;;  %v231_v4 = vmul.f32 %v226_v3, %v644_v8  ;;  %v232_v6 = vmul.f32 %v226_v3, %v641_v5  ;;  %v233_v7 = vmul.f32 %v226_v3, %v648_v12 }
 0x1bc   :  { %241 = vperm.xlu2 %410, %v217_v1  }
 0x216   :  { %v242_v9 = vpop.permute.xlu2 %241 }
 0x217   :  { %v666_v10 = vadd.f32 %v242_v9, %v231_v4  ;;  %v668_v11 = vadd.f32 %v242_v9, %v232_v6  ;;  %v670_v13 = vadd.f32 %v242_v9, %v233_v7 }
 0x219   :  { %v383_v50 = vmul.f32 -1.442695, %v666_v10  ;;  %v384_v52 = vmul.f32 -1.442695, %v668_v11  ;;  %v385_v14 = vmul.f32 -1.442695, %v670_v13 }
 0x21b   :  { %415 = vpow2.f32 %v383_v50 }
 0x21c   :  { %417 = vpow2.f32 %v384_v52 }
 0x21d   :  { %419 = vpow2.f32 %v385_v14 }
 0x221   :  { %v416_v8 = vpop.eup %415 }
 0x222   :  { %v418_v5 = vpop.eup %417  ;;  %v271_v15 = vadd.f32 1.0, %v416_v8 }
 0x223   :  { %v420_v12 = vpop.eup %419  ;;  %v272_v16 = vadd.f32 1.0, %v418_v5 }
 0x224   :  { %v273_v17 = vadd.f32 1.0, %v420_v12  ;;  %421 = vrcp.f32 %v271_v15  ;;  %vm324_vm7 = vweird.f32 %v271_v15  ;;  %v328_v62 = vand.u32 2147483647, %v271_v15 }
 0x225   :  { %423 = vrcp.f32 %v272_v16  ;;  %v330_v30 = vand.u32 2147483648, %v271_v15  ;;  %vm339_vm8 = vweird.f32 %v272_v16  ;;  %v343_v35 = vand.u32 2147483647, %v272_v16 }
 0x226   :  { %425 = vrcp.f32 %v273_v17  ;;  %v237_v21 = vpop.permute.xlu0 %236  ;;  %v345_v36 = vand.u32 2147483648, %v272_v16  ;;  %v358_v39 = vand.u32 2147483647, %v273_v17  ;;  %vm687_vm10 = vcmp.eq.f32.partialorder %v328_v62, 8.507059e+37 }
 0x227   :  { %v678_v22 = vadd.f32 %v237_v21, %v228_v18  ;;  %v680_v23 = vadd.f32 %v237_v21, %v229_v19  ;;  %v682_v24 = vadd.f32 %v237_v21, %v230_v20  ;;  %v360_v42 = vand.u32 2147483648, %v273_v17 }
 0x228   :  { %vm354_vm12 = vweird.f32 %v273_v17  ;;  %v331_v46 = vor.u32 1.1754944e-38, %v330_v30  ;;  %vm344_vm15 = vcmp.eq.f32.partialorder %v343_v35, 8.507059e+37  ;;  %v346_v48 = vor.u32 1.1754944e-38, %v345_v36 }
 0x229   :  { %v380_v26 = vmul.f32 -1.442695, %v678_v22  ;;  %v381_v27 = vmul.f32 -1.442695, %v680_v23  ;;  %v382_v28 = vmul.f32 -1.442695, %v682_v24 }
 0x22a   :  { %v422_v25 = vpop.eup %421  ;;  %vm359_vm2 = vcmp.eq.f32.partialorder %v358_v39, 8.507059e+37  ;;  %v361_v60 = vor.u32 1.1754944e-38, %v360_v42 }
 0x22b   :  { %v424_v57 = vpop.eup %423  ;;  %v320_v29 = vmul.f32 %v422_v25, %v271_v15  ;;  %427 = vpow2.f32 %v380_v26  ;;  %vm325_vm9 = vweird.f32 %v422_v25 }
 0x22c   :  { %v426_v55 = vpop.eup %425  ;;  %v335_v31 = vmul.f32 %v424_v57, %v272_v16  ;;  %429 = vpow2.f32 %v381_v27  ;;  %vm340_vm11 = vweird.f32 %v424_v57  ;;  %vm326_vm14 = vmor %vm324_vm7, %vm325_vm9 }
 0x22d   :  { %v321_v32 = vsub.f32 1.0, %v320_v29  ;;  %v350_v33 = vmul.f32 %v426_v55, %v273_v17  ;;  %431 = vpow2.f32 %v382_v28  ;;  %vm355_vm13 = vweird.f32 %v426_v55  ;;  %vm341_vm1 = vmor %vm339_vm8, %vm340_vm11 }
 0x22e   :  { %v336_v34 = vsub.f32 1.0, %v335_v31  ;;  %vm356_vm3 = vmor %vm354_vm12, %vm355_vm13 }
 0x22f   :  { %v322_v37 = vmul.f32 %v422_v25, %v321_v32  ;;  %v351_v38 = vsub.f32 1.0, %v350_v33 }
 0x230   :  { %v337_v41 = vmul.f32 %v424_v57, %v336_v34 }
 0x231   :  { %v323_v43 = vadd.f32 %v422_v25, %v322_v37  ;;  %v352_v44 = vmul.f32 %v426_v55, %v351_v38  ;;  %v428_v45 = vpop.eup %427 }
 0x232   :  { %v338_v47 = vadd.f32 %v424_v57, %v337_v41  ;;  %v430_v49 = vpop.eup %429  ;;  %v268_v54 = vadd.f32 1.0, %v428_v45 }
 0x233   :  { %v327_v51 = vsel %vm326_vm14, %v422_v25, %v323_v43  ;;  %v353_v53 = vadd.f32 %v426_v55, %v352_v44  ;;  %v432_v56 = vpop.eup %431  ;;  %v269_v61 = vadd.f32 1.0, %v430_v49 }
 0x234   :  { %v332_v58 = vsel %vm687_vm10, %v331_v46, %v327_v51  ;;  %v342_v59 = vsel %vm341_vm1, %v424_v57, %v338_v47  ;;  %v270_v2 = vadd.f32 1.0, %v432_v56  ;;  %433 = vrcp.f32 %v268_v54 }
 0x235   :  { %v347_v63 = vsel %vm344_vm15, %v346_v48, %v342_v59  ;;  %v357_v0 = vsel %vm356_vm3, %v426_v55, %v353_v53  ;;  %v367_v1 = vmul.f32 %v332_v58, %v666_v10  ;;  %435 = vrcp.f32 %v269_v61 }
 0x236   :  { %v362_v3 = vsel %vm359_vm2, %v361_v60, %v357_v0  ;;  %v368_v4 = vmul.f32 %v347_v63, %v668_v11  ;;  %437 = vrcp.f32 %v270_v2  ;;  %vm279_vm4 = vweird.f32 %v268_v54 }
 0x237   :  { %v369_v6 = vmul.f32 %v362_v3, %v670_v13  ;;  %373 = vst [vmem:[%s728_s3 + $0x18] sm:$0xff] %v367_v1  ;;  %v283_v14 = vand.u32 2147483647, %v268_v54  ;;  %v285_v8 = vand.u32 2147483648, %v268_v54  ;;  %v300_v12 = vand.u32 2147483648, %v269_v61 }
 0x238   :  { %374 = vst [vmem:[%s728_s3 + $0x20] sm:$0xff] %v368_v4  ;;  %v298_v18 = vand.u32 2147483647, %v269_v61  ;;  %v315_v19 = vand.u32 2147483648, %v270_v2  ;;  %v313_v25 = vand.u32 2147483647, %v270_v2  ;;  %vm294_vm10 = vweird.f32 %v269_v61 }
 0x239   :  { %375 = vst.msk [vmem:[%s728_s3 + $0x28] sm:$0xff] %vm146_vm0, %v369_v6  ;;  %vm284_vm9 = vcmp.eq.f32.partialorder %v283_v14, 8.507059e+37  ;;  %v286_v26 = vor.u32 1.1754944e-38, %v285_v8  ;;  %v301_v57 = vor.u32 1.1754944e-38, %v300_v12  ;;  %vm309_vm12 = vweird.f32 %v270_v2 }
 0x23a   :  { %v434_v7 = vpop.eup %433  ;;  %vm299_vm13 = vcmp.eq.f32.partialorder %v298_v18, 8.507059e+37  ;;  %v316_v30 = vor.u32 1.1754944e-38, %v315_v19  ;;  %vm314_vm15 = vcmp.eq.f32.partialorder %v313_v25, 8.507059e+37 }
 0x23b   :  { %v436_v9 = vpop.eup %435  ;;  %v275_v10 = vmul.f32 %v434_v7, %v268_v54  ;;  %vm280_vm5 = vweird.f32 %v434_v7 }
 0x23c   :  { %v438_v11 = vpop.eup %437  ;;  %v290_v13 = vmul.f32 %v436_v9, %v269_v61  ;;  %vm295_vm6 = vweird.f32 %v436_v9  ;;  %vm281_vm8 = vmor %vm279_vm4, %vm280_vm5 }
 0x23d   :  { %v276_v50 = vsub.f32 1.0, %v275_v10  ;;  %v305_v52 = vmul.f32 %v438_v11, %v270_v2  ;;  %vm310_vm7 = vweird.f32 %v438_v11  ;;  %vm296_vm11 = vmor %vm294_vm10, %vm295_vm6 }
 0x23e   :  { %v291_v5 = vsub.f32 1.0, %v290_v13  ;;  %vm311_vm14 = vmor %vm309_vm12, %vm310_vm7 }
 0x23f   :  { %v277_v15 = vmul.f32 %v434_v7, %v276_v50  ;;  %v306_v16 = vsub.f32 1.0, %v305_v52 }
 0x240   :  { %v292_v17 = vmul.f32 %v436_v9, %v291_v5 }
 0x241   :  { %v278_v20 = vadd.f32 %v434_v7, %v277_v15  ;;  %v307_v21 = vmul.f32 %v438_v11, %v306_v16 }
 0x242   :  { %v293_v27 = vadd.f32 %v436_v9, %v292_v17 }
 0x243   :  { %v282_v28 = vsel %vm281_vm8, %v434_v7, %v278_v20  ;;  %v308_v29 = vadd.f32 %v438_v11, %v307_v21 }
 0x244   :  { %v287_v55 = vsel %vm284_vm9, %v286_v26, %v282_v28  ;;  %v297_v62 = vsel %vm296_vm11, %v436_v9, %v293_v27 }
 0x245   :  { %v302_v31 = vsel %vm299_vm13, %v301_v57, %v297_v62  ;;  %v312_v32 = vsel %vm311_vm14, %v438_v11, %v308_v29  ;;  %v364_v33 = vmul.f32 %v287_v55, %v678_v22 }
 0x246   :  { %v317_v34 = vsel %vm314_vm15, %v316_v30, %v312_v32  ;;  %v365_v35 = vmul.f32 %v302_v31, %v680_v23 }
 0x247   :  { %v366_v36 = vmul.f32 %v317_v34, %v682_v24  ;;  %370 = vst [vmem:[%s728_s3] sm:$0xff] %v364_v33 }
 0x248   :  { %371 = vst [vmem:[%s728_s3 + $0x8] sm:$0xff] %v365_v35 }
 0x249   :  { %372 = vst.msk [vmem:[%s728_s3 + $0x10] sm:$0xff] %vm146_vm0, %v366_v36 }

// kernel: encoder_forward.6
= control target key start
LH: loop header
LB: loop body
LE: loop exit
PB: predicated region body
PF: predicated region fallthrough
CT: control target
= control target key end

     0   :  { %v465_v14 = vmov 0   ;;  %vm136_vm0 = vcmask 441344   ;;  %s700_s1 = inlined_call_operand.vmem [shape: f32[256,54], index: 1, kind: input, shape index: {}]   ;;  %s701_s0 = inlined_call_operand.vmem [shape: f32[32,3], index: 0, kind: input, shape index: {}]   ;;  %s702_s2 = inlined_call_operand.vmem [shape: f32[32,256], index: 2, kind: input, shape index: {}]   ;;  %s703_s3 = inlined_call_operand.vmem [shape: f32[32,54], index: 3, kind: output, shape index: {}]  }
   0x1   :  { %v37_v0 = vld [vmem:[%s700_s1 + $0x78] sm:$0xff]  ;;  %v36_v1 = vld [vmem:[%s700_s1 + $0x70] sm:$0xff]  ;;  %v35_v4 = vld [vmem:[%s700_s1 + $0x68] sm:$0xff]  ;;  %433 = vset.pattern.permute.xlu0 %v465_v14  ;;  %434 = vset.pattern.permute.xlu1 %v465_v14 }
   0x2   :  { %v53_v2 = vld [vmem:[%s700_s1 + $0xf8] sm:$0xff]  ;;  %78 = vmatpush.msra.mxu0 %v37_v0  ;;  %v52_v3 = vld [vmem:[%s700_s1 + $0xf0] sm:$0xff]  ;;  %v51_v5 = vld [vmem:[%s700_s1 + $0xe8] sm:$0xff]  ;;  %397 = vmatpush.msra.mxu2 %v37_v0 }
   0x3   :  { %107 = vmatpush.msra.mxu1 %v53_v2  ;;  %413 = vmatpush.msra.mxu3 %v53_v2  ;;  %v34_v6 = vld [vmem:[%s700_s1 + $0x60] sm:$0xff]  ;;  %v33_v8 = vld [vmem:[%s700_s1 + $0x58] sm:$0xff]  ;;  %v32_v10 = vld [vmem:[%s700_s1 + $0x50] sm:$0xff] }
   0x4   :  { %79 = vmatpush.msra.mxu0 %v36_v1  ;;  %v50_v7 = vld [vmem:[%s700_s1 + $0xe0] sm:$0xff]  ;;  %398 = vmatpush.msra.mxu2 %v36_v1  ;;  %v49_v9 = vld [vmem:[%s700_s1 + $0xd8] sm:$0xff]  ;;  %v48_v11 = vld [vmem:[%s700_s1 + $0xd0] sm:$0xff] }
   0x5   :  { %108 = vmatpush.msra.mxu1 %v52_v3  ;;  %414 = vmatpush.msra.mxu3 %v52_v3  ;;  %v31_v12 = vld [vmem:[%s700_s1 + $0x48] sm:$0xff]  ;;  %v535_v15 = vld [vmem:[%s701_s0] sm:$0xff]  ;;  %v29_v18 = vld [vmem:[%s700_s1 + $0x38] sm:$0xff] }
   0x6   :  { %80 = vmatpush.msra.mxu0 %v35_v4  ;;  %399 = vmatpush.msra.mxu2 %v35_v4  ;;  %v47_v13 = vld [vmem:[%s700_s1 + $0xc8] sm:$0xff]  ;;  %v30_v16 = vld [vmem:[%s700_s1 + $0x40] sm:$0xff]  ;;  %v45_v19 = vld [vmem:[%s700_s1 + $0xb8] sm:$0xff] }
   0x7   :  { %109 = vmatpush.msra.mxu1 %v51_v5  ;;  %415 = vmatpush.msra.mxu3 %v51_v5  ;;  %v46_v17 = vld [vmem:[%s700_s1 + $0xc0] sm:$0xff]  ;;  %v28_v20 = vld [vmem:[%s700_s1 + $0x30] sm:$0xff]  ;;  %v27_v22 = vld [vmem:[%s700_s1 + $0x28] sm:$0xff] }
   0x8   :  { %81 = vmatpush.msra.mxu0 %v34_v6  ;;  %400 = vmatpush.msra.mxu2 %v34_v6  ;;  %v44_v21 = vld [vmem:[%s700_s1 + $0xb0] sm:$0xff]  ;;  %v43_v23 = vld [vmem:[%s700_s1 + $0xa8] sm:$0xff]  ;;  %v26_v25 = vld [vmem:[%s700_s1 + $0x20] sm:$0xff] }
   0x9   :  { %110 = vmatpush.msra.mxu1 %v50_v7  ;;  %416 = vmatpush.msra.mxu3 %v50_v7  ;;  %v565_v24 = vld [vmem:[%s701_s0 + $0x8] sm:$0xff]  ;;  %v42_v26 = vld [vmem:[%s700_s1 + $0xa0] sm:$0xff]  ;;  %v25_v27 = vld [vmem:[%s700_s1 + $0x18] sm:$0xff] }
   0xa   :  { %82 = vmatpush.msra.mxu0 %v33_v8  ;;  %401 = vmatpush.msra.mxu2 %v33_v8  ;;  %v41_v28 = vld [vmem:[%s700_s1 + $0x98] sm:$0xff]  ;;  %v24_v29 = vld [vmem:[%s700_s1 + $0x10] sm:$0xff]  ;;  %v23_v31 = vld [vmem:[%s700_s1 + $0x8] sm:$0xff] }
   0xb   :  { %111 = vmatpush.msra.mxu1 %v49_v9  ;;  %417 = vmatpush.msra.mxu3 %v49_v9  ;;  %v40_v30 = vld [vmem:[%s700_s1 + $0x90] sm:$0xff]  ;;  %v39_v32 = vld [vmem:[%s700_s1 + $0x88] sm:$0xff]  ;;  %v22_v33 = vld [vmem:[%s700_s1] sm:$0xff] }
   0xc   :  { %83 = vmatpush.msra.mxu0 %v32_v10  ;;  %402 = vmatpush.msra.mxu2 %v32_v10  ;;  %v38_v34 = vld [vmem:[%s700_s1 + $0x80] sm:$0xff]  ;;  %v15_v36 = vld [vmem:[%s702_s2 + $0x8] sm:$0xff]  ;;  %v610_v38 = vld [vmem:[%s701_s0 + $0x10] sm:$0xff] }
   0xd   :  { %112 = vmatpush.msra.mxu1 %v48_v11  ;;  %60 = vperm.xlu0 %433, %v535_v15   ;;  %v14_v35 = vld [vmem:[%s702_s2] sm:$0xff]  ;;  %v19_v39 = vld [vmem:[%s702_s2 + $0x28] sm:$0xff]  ;;  %v16_v40 = vld [vmem:[%s702_s2 + $0x10] sm:$0xff] }
   0xe   :  { %84 = vmatpush.msra.mxu0 %v31_v12  ;;  %403 = vmatpush.msra.mxu2 %v31_v12  ;;  %v18_v37 = vld [vmem:[%s702_s2 + $0x20] sm:$0xff]  ;;  %v17_v41 = vld [vmem:[%s702_s2 + $0x18] sm:$0xff]  ;;  %v20_v42 = vld [vmem:[%s702_s2 + $0x30] sm:$0xff] }
   0xf   :  { %113 = vmatpush.msra.mxu1 %v47_v13  ;;  %418 = vmatpush.msra.mxu3 %v48_v11  ;;  %v629_v43 = vld [vmem:[%s701_s0 + $0x18] sm:$0xff]  ;;  %s467_s0 = smov 1  }
  0x10   :  { %85 = vmatpush.msra.mxu0 %v30_v16  ;;  %404 = vmatpush.msra.mxu2 %v30_v16  ;;  %v21_v44 = vld [vmem:[%s702_s2 + $0x38] sm:$0xff] }
  0x11   :  { %114 = vmatpush.msra.mxu1 %v46_v17  ;;  %419 = vmatpush.msra.mxu3 %v47_v13 }
  0x12   :  { %86 = vmatpush.msra.mxu0 %v29_v18  ;;  %405 = vmatpush.msra.mxu2 %v29_v18 }
  0x13   :  { %115 = vmatpush.msra.mxu1 %v45_v19  ;;  %420 = vmatpush.msra.mxu3 %v46_v17 }
  0x14   :  { %87 = vmatpush.msra.mxu0 %v28_v20  ;;  %406 = vmatpush.msra.mxu2 %v28_v20 }
  0x15   :  { %116 = vmatpush.msra.mxu1 %v44_v21  ;;  %421 = vmatpush.msra.mxu3 %v45_v19 }
  0x16   :  { %88 = vmatpush.msra.mxu0 %v27_v22  ;;  %65 = vperm.xlu0 %433, %v565_v24  }
  0x17   :  { %117 = vmatpush.msra.mxu1 %v43_v23  ;;  %407 = vmatpush.msra.mxu2 %v27_v22 }
  0x18   :  { %89 = vmatpush.msra.mxu0 %v26_v25  ;;  %422 = vmatpush.msra.mxu3 %v44_v21 }
  0x19   :  { %118 = vmatpush.msra.mxu1 %v42_v26  ;;  %408 = vmatpush.msra.mxu2 %v26_v25 }
  0x1a   :  { %90 = vmatpush.msra.mxu0 %v25_v27  ;;  %423 = vmatpush.msra.mxu3 %v43_v23 }
  0x1b   :  { %119 = vmatpush.msra.mxu1 %v41_v28  ;;  %409 = vmatpush.msra.mxu2 %v25_v27 }
  0x1c   :  { %91 = vmatpush.msra.mxu0 %v24_v29  ;;  %424 = vmatpush.msra.mxu3 %v42_v26 }
  0x1d   :  { %120 = vmatpush.msra.mxu1 %v40_v30  ;;  %410 = vmatpush.msra.mxu2 %v24_v29 }
  0x1e   :  { %92 = vmatpush.msra.mxu0 %v23_v31  ;;  %425 = vmatpush.msra.mxu3 %v41_v28 }
  0x1f   :  { %121 = vmatpush.msra.mxu1 %v39_v32  ;;  %411 = vmatpush.msra.mxu2 %v23_v31 }
  0x20   :  { %93 = vmatpush.msra.mxu0 %v22_v33  ;;  %426 = vmatpush.msra.mxu3 %v40_v30 }
  0x21   :  { %122 = vmatpush.msra.mxu1 %v38_v34  ;;  %94 = vmatmul.f32.vlgmr.msra.gmra.mxu0 %v14_v35 }
  0x22   :  { %123 = vmatmul.f32.vlgmr.msra.gmra.mxu1 %v15_v36  ;;  %412 = vmatpush.msra.mxu2 %v22_v33 }
  0x23   :  { %427 = vmatpush.msra.mxu3 %v39_v32  ;;  %100 = vmatmul.f32.vlgmr.msra.gmra.mxu2 %v18_v37  ;;  %v466_v32 = vmov 1  }
  0x24   :  { %70 = vperm.xlu1 %434, %v610_v38   ;;  %435 = vset.pattern.permute.xlu0 %v466_v32 }
  0x25   :  { %428 = vmatpush.msra.mxu3 %v38_v34  ;;  %436 = vset.pattern.permute.xlu2 %v466_v32 }
  0x26   :  { %129 = vmatmul.f32.vlgmr.msra.gmra.mxu3 %v19_v39 }
  0x29   :  { %97 = vmatmul.f32.gmra.mxu0 %v16_v40 }
  0x2a   :  { %126 = vmatmul.f32.gmra.mxu1 %v17_v41 }
  0x2b   :  { %103 = vmatmul.f32.gmra.mxu2 %v20_v42 }
  0x2c   :  { %75 = vperm.xlu1 %434, %v629_v43  }
  0x2e   :  { %132 = vmatmul.f32.gmra.mxu3 %v21_v44 }
  0x34   :  { %437 = vset.pattern.permute.xlu1 %v466_v32 }
  0x7f   :  { %v61_v45 = vpop.permute.xlu0 %60 }
  0x88   :  { %v66_v52 = vpop.permute.xlu0 %65 }
  0x96   :  { %v71_v51 = vpop.permute.xlu1 %70 }
  0x9e   :  { %v95_v46 = vpop.f32.mrf.mxu0  ;;  %v76_v63 = vpop.permute.xlu1 %75 }
  0x9f   :  { %v124_v47 = vpop.f32.mrf.mxu1  ;;  %v96_v48 = vadd.f32 %v95_v46, %v61_v45 }
  0xa1   :  { %v635_v49 = vadd.f32 %v124_v47, %v96_v48 }
  0xa3   :  { %v137_v50 = vsel %vm136_vm0, %v635_v49, 0.0  ;;  %v153_v0 = vmul.f32 %v635_v49, %v635_v49 }
  0xa4   :  { %138 = vadd.xlane.f32.xlu2 %v137_v50 }
  0xa5   :  { %v157_v4 = vsel %vm136_vm0, %v153_v0, 0.0 }
  0xa6   :  { %v98_v53 = vpop.f32.mrf.mxu0  ;;  %v101_v56 = vpop.f32.mrf.mxu2 }
  0xa7   :  { %v127_v54 = vpop.f32.mrf.mxu1  ;;  %v99_v55 = vadd.f32 %v98_v53, %v66_v52  ;;  %v102_v58 = vadd.f32 %v101_v56, %v71_v51 }
  0xa9   :  { %v639_v57 = vadd.f32 %v127_v54, %v99_v55  ;;  %v130_v59 = vpop.f32.mrf.mxu3 }
  0xaa   :  { %v643_v61 = vadd.f32 %v130_v59, %v102_v58 }
  0xab   :  { %v140_v60 = vsel %vm136_vm0, %v639_v57, 0.0  ;;  %v154_v7 = vmul.f32 %v639_v57, %v639_v57 }
  0xac   :  { %141 = vadd.xlane.f32.xlu2 %v140_v60  ;;  %v143_v62 = vsel %vm136_vm0, %v643_v61, 0.0  ;;  %v155_v9 = vmul.f32 %v643_v61, %v643_v61 }
  0xad   :  { %144 = vadd.xlane.f32.xlu0 %v143_v62  ;;  %v160_v8 = vsel %vm136_vm0, %v154_v7, 0.0 }
  0xae   :  { %v104_v1 = vpop.f32.mrf.mxu2  ;;  %v163_v10 = vsel %vm136_vm0, %v155_v9, 0.0 }
  0xaf   :  { %v105_v2 = vadd.f32 %v104_v1, %v76_v63 }
  0xb1   :  { %v133_v3 = vpop.f32.mrf.mxu3 }
  0xb2   :  { %v650_v5 = vadd.f32 %v133_v3, %v105_v2 }
  0xb4   :  { %158 = vadd.xlane.f32.xlu2 %v157_v4  ;;  %v146_v6 = vsel %vm136_vm0, %v650_v5, 0.0  ;;  %v156_v11 = vmul.f32 %v650_v5, %v650_v5 }
  0xb5   :  { %147 = vadd.xlane.f32.xlu1 %v146_v6 }
  0xb6   :  { %v166_v12 = vsel %vm136_vm0, %v156_v11, 0.0 }
  0xbc   :  { %161 = vadd.xlane.f32.xlu2 %v160_v8 }
  0xc4   :  { %164 = vadd.xlane.f32.xlu2 %v163_v10 }
  0xcc   :  { %167 = vadd.xlane.f32.xlu2 %v166_v12 }
 0x117   :  { %v139_v13 = vpop.xlane.xlu2 %138 }
 0x118   :  { %v149_v16 = vmul.f32 0.018518519, %v139_v13 }
 0x11a   :  { %v173_v18 = vmul.f32 %v149_v16, %v149_v16 }
 0x11f   :  { %v142_v14 = vpop.xlane.xlu2 %141 }
 0x120   :  { %v150_v21 = vmul.f32 0.018518519, %v142_v14  ;;  %v145_v26 = vpop.xlane.xlu0 %144 }
 0x121   :  { %v663_v30 = vmul.f32 0.018518519, %v145_v26 }
 0x122   :  { %v174_v27 = vmul.f32 %v150_v21, %v150_v21 }
 0x123   :  { %v175_v35 = vmul.f32 %v663_v30, %v663_v30 }
 0x127   :  { %v159_v17 = vpop.xlane.xlu2 %158 }
 0x128   :  { %v169_v19 = vmul.f32 0.018518519, %v159_v17  ;;  %v148_v39 = vpop.xlane.xlu1 %147 }
 0x129   :  { %v152_v44 = vmul.f32 0.018518519, %v148_v39 }
 0x12a   :  { %v177_v20 = vsub.f32 %v169_v19, %v173_v18 }
 0x12b   :  { %v176_v51 = vmul.f32 %v152_v44, %v152_v44 }
 0x12c   :  { %v181_v22 = vmax.f32 %v177_v20, 0.0 }
 0x12e   :  { %v185_v23 = vadd.f32 1e-05, %v181_v22 }
 0x12f   :  { %v162_v25 = vpop.xlane.xlu2 %161 }
 0x130   :  { %441 = vrsqrt.f32 %v185_v23  ;;  %v170_v28 = vmul.f32 0.018518519, %v162_v25  ;;  %vm195_vm2 = vweird.f32 %v185_v23 }
 0x132   :  { %v178_v29 = vsub.f32 %v170_v28, %v174_v27  ;;  %v468_v28 = vmov 2  }
 0x134   :  { %v182_v31 = vmax.f32 %v178_v29, 0.0 }
 0x136   :  { %v442_v33 = vpop.eup %441  ;;  %v186_v34 = vadd.f32 1e-05, %v182_v31 }
 0x137   :  { %v190_v36 = vmul.f32 %v442_v33, %v185_v23  ;;  %v165_v37 = vpop.xlane.xlu2 %164  ;;  %vm196_vm1 = vweird.f32 %v442_v33 }
 0x138   :  { %443 = vrsqrt.f32 %v186_v34  ;;  %v171_v40 = vmul.f32 0.018518519, %v165_v37  ;;  %vm197_vm3 = vmor %vm195_vm2, %vm196_vm1  ;;  %vm205_vm5 = vweird.f32 %v186_v34 }
 0x139   :  { %v191_v41 = vmul.f32 %v442_v33, %v190_v36 }
 0x13a   :  { %v179_v42 = vsub.f32 %v171_v40, %v175_v35 }
 0x13b   :  { %v192_v45 = vmul.f32 0.5, %v191_v41 }
 0x13c   :  { %v183_v46 = vmax.f32 %v179_v42, 0.0 }
 0x13d   :  { %v193_v47 = vsub.f32 1.5, %v192_v45 }
 0x13e   :  { %v444_v48 = vpop.eup %443  ;;  %v187_v50 = vadd.f32 1e-05, %v183_v46 }
 0x13f   :  { %v200_v52 = vmul.f32 %v444_v48, %v186_v34  ;;  %v168_v53 = vpop.xlane.xlu2 %167  ;;  %v194_v54 = vmul.f32 %v442_v33, %v193_v47  ;;  %vm206_vm4 = vweird.f32 %v444_v48 }
 0x140   :  { %445 = vrsqrt.f32 %v187_v50  ;;  %v172_v55 = vmul.f32 0.018518519, %v168_v53  ;;  %vm207_vm6 = vmor %vm205_vm5, %vm206_vm4  ;;  %vm215_vm7 = vweird.f32 %v187_v50 }
 0x141   :  { %v201_v56 = vmul.f32 %v444_v48, %v200_v52  ;;  %v198_v58 = vsel %vm197_vm3, %v442_v33, %v194_v54 }
 0x142   :  { %v180_v59 = vsub.f32 %v172_v55, %v176_v51  ;;  %v229_v60 = vmul.f32 %v198_v58, %v535_v15 }
 0x143   :  { %v202_v62 = vmul.f32 0.5, %v201_v56 }
 0x144   :  { %v184_v63 = vmax.f32 %v180_v59, 0.0  ;;  %v233_v0 = vmul.f32 %v229_v60, %v149_v16 }
 0x145   :  { %v203_v1 = vsub.f32 1.5, %v202_v62 }
 0x146   :  { %v446_v2 = vpop.eup %445  ;;  %v188_v3 = vadd.f32 1e-05, %v184_v63  ;;  %241 = vrot.lane.b32.xlu2 %v233_v0, %s467_s0 }
 0x147   :  { %v210_v4 = vmul.f32 %v446_v2, %v187_v50  ;;  %v204_v6 = vmul.f32 %v444_v48, %v203_v1  ;;  %vm216_vm8 = vweird.f32 %v446_v2 }
 0x148   :  { %447 = vrsqrt.f32 %v188_v3  ;;  %vm217_vm9 = vmor %vm215_vm7, %vm216_vm8  ;;  %vm225_vm11 = vweird.f32 %v188_v3 }
 0x149   :  { %v211_v7 = vmul.f32 %v446_v2, %v210_v4  ;;  %v208_v8 = vsel %vm207_vm6, %v444_v48, %v204_v6 }
 0x14a   :  { %v230_v9 = vmul.f32 %v208_v8, %v565_v24 }
 0x14b   :  { %v212_v10 = vmul.f32 0.5, %v211_v7 }
 0x14c   :  { %v234_v11 = vmul.f32 %v230_v9, %v150_v21 }
 0x14d   :  { %v213_v12 = vsub.f32 1.5, %v212_v10 }
 0x14e   :  { %v448_v13 = vpop.eup %447  ;;  %243 = vrot.lane.b32.xlu0 %v234_v11, %s467_s0 }
 0x14f   :  { %v220_v14 = vmul.f32 %v448_v13, %v188_v3  ;;  %v214_v16 = vmul.f32 %v446_v2, %v213_v12  ;;  %vm226_vm10 = vweird.f32 %v448_v13 }
 0x150   :  { %vm227_vm12 = vmor %vm225_vm11, %vm226_vm10 }
 0x151   :  { %v221_v17 = vmul.f32 %v448_v13, %v220_v14  ;;  %v218_v18 = vsel %vm217_vm9, %v446_v2, %v214_v16 }
 0x152   :  { %v231_v19 = vmul.f32 %v218_v18, %v610_v38 }
 0x153   :  { %v222_v20 = vmul.f32 0.5, %v221_v17 }
 0x154   :  { %v235_v22 = vmul.f32 %v231_v19, %v663_v30 }
 0x155   :  { %v223_v23 = vsub.f32 1.5, %v222_v20 }
 0x156   :  { %259 = vperm.xlu0 %435, %v229_v60   ;;  %245 = vrot.lane.b32.xlu1 %v235_v22, %s467_s0 }
 0x157   :  { %v224_v21 = vmul.f32 %v448_v13, %v223_v23 }
 0x159   :  { %v228_v25 = vsel %vm227_vm12, %v448_v13, %v224_v21 }
 0x15a   :  { %v232_v26 = vmul.f32 %v228_v25, %v629_v43 }
 0x15c   :  { %v236_v27 = vmul.f32 %v232_v26, %v152_v44 }
 0x15e   :  { %247 = vrot.lane.b32.xlu2 %v236_v27, %s467_s0  ;;  %269 = vperm.xlu1 %437, %v231_v19  }
 0x15f   :  { %439 = vset.pattern.permute.xlu0 %v468_v28 }
 0x166   :  { %264 = vperm.xlu2 %436, %v230_v9   ;;  %438 = vset.pattern.permute.xlu1 %v468_v28 }
 0x16e   :  { %274 = vperm.xlu2 %436, %v232_v26  }
 0x176   :  { %440 = vset.pattern.permute.xlu2 %v468_v28 }
 0x1a0   :  { %v242_v29 = vpop.permute.xlu2 %241 }
 0x1a1   :  { %v253_v30 = vsub.f32 %v535_v15, %v242_v29 }
 0x1a3   :  { %283 = vperm.xlu1 %438, %v253_v30  }
 0x1b8   :  { %v248_v31 = vpop.permute.xlu2 %247 }
 0x1b9   :  { %v256_v32 = vsub.f32 %v629_v43, %v248_v31 }
 0x1bb   :  { %298 = vperm.xlu1 %438, %v256_v32  }
 0x1c0   :  { %v244_v33 = vpop.permute.xlu0 %243  ;;  %v265_v40 = vpop.permute.xlu2 %264 }
 0x1c1   :  { %v254_v34 = vsub.f32 %v565_v24, %v244_v33 }
 0x1c3   :  { %288 = vperm.xlu0 %439, %v254_v34  }
 0x1c8   :  { %v246_v35 = vpop.permute.xlu1 %245  ;;  %v260_v39 = vpop.permute.xlu0 %259 }
 0x1c9   :  { %v255_v36 = vsub.f32 %v610_v38, %v246_v35  ;;  %v277_v41 = vmul.f32 %v260_v39, %v635_v49  ;;  %v275_v45 = vpop.permute.xlu2 %274 }
 0x1ca   :  { %v280_v52 = vmul.f32 %v275_v45, %v650_v5  ;;  %v278_v5 = vmul.f32 %v265_v40, %v639_v57 }
 0x1cb   :  { %293 = vperm.xlu2 %440, %v255_v36  }
 0x1d0   :  { %v270_v37 = vpop.permute.xlu1 %269 }
 0x1d1   :  { %v279_v24 = vmul.f32 %v270_v37, %v643_v61 }
 0x215   :  { %v284_v42 = vpop.permute.xlu1 %283 }
 0x216   :  { %v301_v15 = vadd.f32 %v284_v42, %v277_v41 }
 0x218   :  { %v393_v44 = vmul.f32 -1.442695, %v301_v15 }
 0x21a   :  { %449 = vpow2.f32 %v393_v44 }
 0x220   :  { %v450_v43 = vpop.eup %449 }
 0x221   :  { %v317_v46 = vadd.f32 1.0, %v450_v43 }
 0x223   :  { %451 = vrcp.f32 %v317_v46  ;;  %v332_v49 = vand.u32 2147483648, %v317_v46  ;;  %v330_v56 = vand.u32 2147483647, %v317_v46  ;;  %vm326_vm14 = vweird.f32 %v317_v46 }
 0x225   :  { %v294_v47 = vpop.permute.xlu2 %293  ;;  %v333_v61 = vor.u32 1.1754944e-38, %v332_v49  ;;  %vm331_vm1 = vcmp.eq.f32.partialorder %v330_v56, 8.507059e+37 }
 0x226   :  { %v303_v48 = vadd.f32 %v294_v47, %v279_v24 }
 0x228   :  { %v395_v50 = vmul.f32 -1.442695, %v303_v48 }
 0x229   :  { %v452_v38 = vpop.eup %451 }
 0x22a   :  { %v322_v51 = vmul.f32 %v452_v38, %v317_v46  ;;  %453 = vpow2.f32 %v395_v50  ;;  %vm327_vm13 = vweird.f32 %v452_v38 }
 0x22b   :  { %vm328_vm15 = vmor %vm326_vm14, %vm327_vm13 }
 0x22c   :  { %v323_v53 = vsub.f32 1.0, %v322_v51 }
 0x22d   :  { %v299_v54 = vpop.permute.xlu1 %298 }
 0x22e   :  { %v324_v55 = vmul.f32 %v452_v38, %v323_v53  ;;  %v304_v58 = vadd.f32 %v299_v54, %v280_v52 }
 0x230   :  { %v454_v59 = vpop.eup %453  ;;  %v325_v60 = vadd.f32 %v452_v38, %v324_v55  ;;  %v396_v62 = vmul.f32 -1.442695, %v304_v58 }
 0x231   :  { %v319_v63 = vadd.f32 1.0, %v454_v59 }
 0x232   :  { %v329_v0 = vsel %vm328_vm15, %v452_v38, %v325_v60  ;;  %455 = vpow2.f32 %v396_v62 }
 0x233   :  { %v334_v1 = vsel %vm331_vm1, %v333_v61, %v329_v0  ;;  %457 = vrcp.f32 %v319_v63  ;;  %v362_v12 = vand.u32 2147483648, %v319_v63  ;;  %v360_v57 = vand.u32 2147483647, %v319_v63 }
 0x234   :  { %v381_v2 = vmul.f32 %v334_v1, %v301_v15  ;;  %vm356_vm3 = vweird.f32 %v319_v63 }
 0x235   :  { %v289_v3 = vpop.permute.xlu0 %288  ;;  %v363_v18 = vor.u32 1.1754944e-38, %v362_v12  ;;  %vm361_vm5 = vcmp.eq.f32.partialorder %v360_v57, 8.507059e+37 }
 0x236   :  { %385 = vst.msk [vmem:[%s703_s3] sm:$0xff] %vm136_vm0, %v381_v2  ;;  %v302_v4 = vadd.f32 %v289_v3, %v278_v5 }
 0x238   :  { %v456_v6 = vpop.eup %455  ;;  %v394_v7 = vmul.f32 -1.442695, %v302_v4 }
 0x239   :  { %v458_v8 = vpop.eup %457  ;;  %v320_v9 = vadd.f32 1.0, %v456_v6 }
 0x23a   :  { %v352_v10 = vmul.f32 %v458_v8, %v319_v63  ;;  %459 = vpow2.f32 %v394_v7  ;;  %vm357_vm2 = vweird.f32 %v458_v8 }
 0x23b   :  { %461 = vrcp.f32 %v320_v9  ;;  %vm358_vm4 = vmor %vm356_vm3, %vm357_vm2  ;;  %v377_v26 = vand.u32 2147483648, %v320_v9  ;;  %v375_v28 = vand.u32 2147483647, %v320_v9  ;;  %vm371_vm7 = vweird.f32 %v320_v9 }
 0x23c   :  { %v353_v11 = vsub.f32 1.0, %v352_v10 }
 0x23d   :  { %v378_v31 = vor.u32 1.1754944e-38, %v377_v26  ;;  %vm376_vm9 = vcmp.eq.f32.partialorder %v375_v28, 8.507059e+37 }
 0x23e   :  { %v354_v13 = vmul.f32 %v458_v8, %v353_v11 }
 0x240   :  { %v460_v14 = vpop.eup %459  ;;  %v355_v16 = vadd.f32 %v458_v8, %v354_v13 }
 0x241   :  { %v462_v17 = vpop.eup %461  ;;  %v318_v19 = vadd.f32 1.0, %v460_v14 }
 0x242   :  { %v359_v20 = vsel %vm358_vm4, %v458_v8, %v355_v16  ;;  %v367_v22 = vmul.f32 %v462_v17, %v320_v9  ;;  %vm372_vm6 = vweird.f32 %v462_v17 }
 0x243   :  { %v364_v23 = vsel %vm361_vm5, %v363_v18, %v359_v20  ;;  %463 = vrcp.f32 %v318_v19  ;;  %vm373_vm8 = vmor %vm371_vm7, %vm372_vm6  ;;  %v347_v37 = vand.u32 2147483648, %v318_v19  ;;  %v345_v40 = vand.u32 2147483647, %v318_v19 }
 0x244   :  { %v383_v21 = vmul.f32 %v364_v23, %v303_v48  ;;  %v368_v25 = vsub.f32 1.0, %v367_v22  ;;  %vm341_vm11 = vweird.f32 %v318_v19 }
 0x245   :  { %v348_v42 = vor.u32 1.1754944e-38, %v347_v37  ;;  %vm346_vm13 = vcmp.eq.f32.partialorder %v345_v40, 8.507059e+37 }
 0x246   :  { %387 = vst.msk [vmem:[%s703_s3 + $0x10] sm:$0xff] %vm136_vm0, %v383_v21  ;;  %v369_v27 = vmul.f32 %v462_v17, %v368_v25 }
 0x248   :  { %v370_v29 = vadd.f32 %v462_v17, %v369_v27 }
 0x249   :  { %v464_v30 = vpop.eup %463 }
 0x24a   :  { %v374_v32 = vsel %vm373_vm8, %v462_v17, %v370_v29  ;;  %v337_v33 = vmul.f32 %v464_v30, %v318_v19  ;;  %vm342_vm10 = vweird.f32 %v464_v30 }
 0x24b   :  { %v379_v34 = vsel %vm376_vm9, %v378_v31, %v374_v32  ;;  %vm343_vm12 = vmor %vm341_vm11, %vm342_vm10 }
 0x24c   :  { %v384_v35 = vmul.f32 %v379_v34, %v304_v58  ;;  %v338_v36 = vsub.f32 1.0, %v337_v33 }
 0x24e   :  { %388 = vst.msk [vmem:[%s703_s3 + $0x18] sm:$0xff] %vm136_vm0, %v384_v35  ;;  %v339_v39 = vmul.f32 %v464_v30, %v338_v36 }
 0x250   :  { %v340_v41 = vadd.f32 %v464_v30, %v339_v39 }
 0x252   :  { %v344_v15 = vsel %vm343_vm12, %v464_v30, %v340_v41 }
 0x253   :  { %v349_v44 = vsel %vm346_vm13, %v348_v42, %v344_v15 }
 0x254   :  { %v382_v45 = vmul.f32 %v349_v44, %v302_v4 }
 0x256   :  { %386 = vst.msk [vmem:[%s703_s3 + $0x8] sm:$0xff] %vm136_vm0, %v382_v45 }

// kernel: encoder_forward.7
= control target key start
LH: loop header
LB: loop body
LE: loop exit
PB: predicated region body
PF: predicated region fallthrough
CT: control target
= control target key end

     0   :  { %vm190_vm0 = vcmask 48128   ;;  %s624_s1 = inlined_call_operand.vmem [shape: f32[512,6], index: 1, kind: input, shape index: {}]   ;;  %s625_s2 = inlined_call_operand.vmem [shape: f32[16,512], index: 2, kind: input, shape index: {}]   ;;  %s626_s0 = inlined_call_operand.vmem [shape: f32[16,3], index: 0, kind: input, shape index: {}]   ;;  %s627_s3 = inlined_call_operand.vmem [shape: f32[16,6], index: 3, kind: output, shape index: {}]  }
   0x1   :  { %v37_v0 = vld [vmem:[%s624_s1 + $0x78] sm:$0xff]  ;;  %v36_v2 = vld [vmem:[%s624_s1 + $0x70] sm:$0xff]  ;;  %v35_v6 = vld [vmem:[%s624_s1 + $0x68] sm:$0xff] }
   0x2   :  { %v69_v1 = vld [vmem:[%s624_s1 + $0x178] sm:$0xff]  ;;  %98 = vmatpush.msra.mxu0 %v37_v0  ;;  %v68_v4 = vld [vmem:[%s624_s1 + $0x170] sm:$0xff]  ;;  %v67_v8 = vld [vmem:[%s624_s1 + $0x168] sm:$0xff] }
   0x3   :  { %144 = vmatpush.msra.mxu2 %v69_v1  ;;  %v53_v3 = vld [vmem:[%s624_s1 + $0xf8] sm:$0xff]  ;;  %v52_v7 = vld [vmem:[%s624_s1 + $0xf0] sm:$0xff]  ;;  %v51_v10 = vld [vmem:[%s624_s1 + $0xe8] sm:$0xff] }
   0x4   :  { %v85_v5 = vld [vmem:[%s624_s1 + $0x1f8] sm:$0xff]  ;;  %121 = vmatpush.msra.mxu1 %v53_v3  ;;  %99 = vmatpush.msra.mxu0 %v36_v2  ;;  %v84_v9 = vld [vmem:[%s624_s1 + $0x1f0] sm:$0xff]  ;;  %v34_v11 = vld [vmem:[%s624_s1 + $0x60] sm:$0xff] }
   0x5   :  { %167 = vmatpush.msra.mxu3 %v85_v5  ;;  %145 = vmatpush.msra.mxu2 %v68_v4  ;;  %v66_v12 = vld [vmem:[%s624_s1 + $0x160] sm:$0xff]  ;;  %v83_v13 = vld [vmem:[%s624_s1 + $0x1e8] sm:$0xff]  ;;  %v33_v16 = vld [vmem:[%s624_s1 + $0x58] sm:$0xff]  ;;  %v344_v5 = vmov 0  }
   0x6   :  { %122 = vmatpush.msra.mxu1 %v52_v7  ;;  %100 = vmatpush.msra.mxu0 %v35_v6  ;;  %v50_v14 = vld [vmem:[%s624_s1 + $0xe0] sm:$0xff]  ;;  %v65_v17 = vld [vmem:[%s624_s1 + $0x158] sm:$0xff]  ;;  %v32_v20 = vld [vmem:[%s624_s1 + $0x50] sm:$0xff] }
   0x7   :  { %168 = vmatpush.msra.mxu3 %v84_v9  ;;  %146 = vmatpush.msra.mxu2 %v67_v8  ;;  %v82_v15 = vld [vmem:[%s624_s1 + $0x1e0] sm:$0xff]  ;;  %v49_v18 = vld [vmem:[%s624_s1 + $0xd8] sm:$0xff]  ;;  %v64_v21 = vld [vmem:[%s624_s1 + $0x150] sm:$0xff] }
   0x8   :  { %123 = vmatpush.msra.mxu1 %v51_v10  ;;  %101 = vmatpush.msra.mxu0 %v34_v11  ;;  %v81_v19 = vld [vmem:[%s624_s1 + $0x1d8] sm:$0xff]  ;;  %v48_v22 = vld [vmem:[%s624_s1 + $0xd0] sm:$0xff]  ;;  %v31_v24 = vld [vmem:[%s624_s1 + $0x48] sm:$0xff] }
   0x9   :  { %169 = vmatpush.msra.mxu3 %v83_v13  ;;  %147 = vmatpush.msra.mxu2 %v66_v12  ;;  %v80_v23 = vld [vmem:[%s624_s1 + $0x1d0] sm:$0xff]  ;;  %v63_v25 = vld [vmem:[%s624_s1 + $0x148] sm:$0xff]  ;;  %v30_v28 = vld [vmem:[%s624_s1 + $0x40] sm:$0xff] }
   0xa   :  { %124 = vmatpush.msra.mxu1 %v50_v14  ;;  %102 = vmatpush.msra.mxu0 %v33_v16  ;;  %v47_v26 = vld [vmem:[%s624_s1 + $0xc8] sm:$0xff]  ;;  %v62_v29 = vld [vmem:[%s624_s1 + $0x140] sm:$0xff]  ;;  %v29_v32 = vld [vmem:[%s624_s1 + $0x38] sm:$0xff] }
   0xb   :  { %170 = vmatpush.msra.mxu3 %v82_v15  ;;  %148 = vmatpush.msra.mxu2 %v65_v17  ;;  %v79_v27 = vld [vmem:[%s624_s1 + $0x1c8] sm:$0xff]  ;;  %v46_v30 = vld [vmem:[%s624_s1 + $0xc0] sm:$0xff]  ;;  %v61_v33 = vld [vmem:[%s624_s1 + $0x138] sm:$0xff] }
   0xc   :  { %125 = vmatpush.msra.mxu1 %v49_v18  ;;  %103 = vmatpush.msra.mxu0 %v32_v20  ;;  %v78_v31 = vld [vmem:[%s624_s1 + $0x1c0] sm:$0xff]  ;;  %v45_v34 = vld [vmem:[%s624_s1 + $0xb8] sm:$0xff]  ;;  %v28_v36 = vld [vmem:[%s624_s1 + $0x30] sm:$0xff] }
   0xd   :  { %171 = vmatpush.msra.mxu3 %v81_v19  ;;  %149 = vmatpush.msra.mxu2 %v64_v21  ;;  %v77_v35 = vld [vmem:[%s624_s1 + $0x1b8] sm:$0xff]  ;;  %v60_v37 = vld [vmem:[%s624_s1 + $0x130] sm:$0xff]  ;;  %v27_v40 = vld [vmem:[%s624_s1 + $0x28] sm:$0xff] }
   0xe   :  { %126 = vmatpush.msra.mxu1 %v48_v22  ;;  %104 = vmatpush.msra.mxu0 %v31_v24  ;;  %v44_v38 = vld [vmem:[%s624_s1 + $0xb0] sm:$0xff]  ;;  %v59_v41 = vld [vmem:[%s624_s1 + $0x128] sm:$0xff]  ;;  %v26_v44 = vld [vmem:[%s624_s1 + $0x20] sm:$0xff] }
   0xf   :  { %172 = vmatpush.msra.mxu3 %v80_v23  ;;  %150 = vmatpush.msra.mxu2 %v63_v25  ;;  %v76_v39 = vld [vmem:[%s624_s1 + $0x1b0] sm:$0xff]  ;;  %v43_v42 = vld [vmem:[%s624_s1 + $0xa8] sm:$0xff]  ;;  %v58_v45 = vld [vmem:[%s624_s1 + $0x120] sm:$0xff] }
  0x10   :  { %127 = vmatpush.msra.mxu1 %v47_v26  ;;  %105 = vmatpush.msra.mxu0 %v30_v28  ;;  %v75_v43 = vld [vmem:[%s624_s1 + $0x1a8] sm:$0xff]  ;;  %v42_v46 = vld [vmem:[%s624_s1 + $0xa0] sm:$0xff]  ;;  %v25_v48 = vld [vmem:[%s624_s1 + $0x18] sm:$0xff] }
  0x11   :  { %173 = vmatpush.msra.mxu3 %v79_v27  ;;  %151 = vmatpush.msra.mxu2 %v62_v29  ;;  %v74_v47 = vld [vmem:[%s624_s1 + $0x1a0] sm:$0xff]  ;;  %v57_v49 = vld [vmem:[%s624_s1 + $0x118] sm:$0xff]  ;;  %v24_v52 = vld [vmem:[%s624_s1 + $0x10] sm:$0xff] }
  0x12   :  { %128 = vmatpush.msra.mxu1 %v46_v30  ;;  %106 = vmatpush.msra.mxu0 %v29_v32  ;;  %v41_v50 = vld [vmem:[%s624_s1 + $0x98] sm:$0xff]  ;;  %v56_v53 = vld [vmem:[%s624_s1 + $0x110] sm:$0xff]  ;;  %v23_v56 = vld [vmem:[%s624_s1 + $0x8] sm:$0xff] }
  0x13   :  { %174 = vmatpush.msra.mxu3 %v78_v31  ;;  %152 = vmatpush.msra.mxu2 %v61_v33  ;;  %v73_v51 = vld [vmem:[%s624_s1 + $0x198] sm:$0xff]  ;;  %v40_v54 = vld [vmem:[%s624_s1 + $0x90] sm:$0xff]  ;;  %v55_v57 = vld [vmem:[%s624_s1 + $0x108] sm:$0xff] }
  0x14   :  { %129 = vmatpush.msra.mxu1 %v45_v34  ;;  %107 = vmatpush.msra.mxu0 %v28_v36  ;;  %v72_v55 = vld [vmem:[%s624_s1 + $0x190] sm:$0xff]  ;;  %v39_v58 = vld [vmem:[%s624_s1 + $0x88] sm:$0xff]  ;;  %v22_v60 = vld [vmem:[%s624_s1] sm:$0xff] }
  0x15   :  { %175 = vmatpush.msra.mxu3 %v77_v35  ;;  %153 = vmatpush.msra.mxu2 %v60_v37  ;;  %v71_v59 = vld [vmem:[%s624_s1 + $0x188] sm:$0xff]  ;;  %v54_v61 = vld [vmem:[%s624_s1 + $0x100] sm:$0xff]  ;;  %v16_v63 = vld [vmem:[%s625_s2 + $0x10] sm:$0xff]  ;;  %v345_v35 = vmov 1  }
  0x16   :  { %130 = vmatpush.msra.mxu1 %v44_v38  ;;  %108 = vmatpush.msra.mxu0 %v27_v40  ;;  %v14_v62 = vld [vmem:[%s625_s2] sm:$0xff]  ;;  %v15_v2 = vld [vmem:[%s625_s2 + $0x8] sm:$0xff]  ;;  %v17_v3 = vld [vmem:[%s625_s2 + $0x18] sm:$0xff] }
  0x17   :  { %176 = vmatpush.msra.mxu3 %v76_v39  ;;  %154 = vmatpush.msra.mxu2 %v59_v41  ;;  %v38_v0 = vld [vmem:[%s624_s1 + $0x80] sm:$0xff]  ;;  %v20_v7 = vld [vmem:[%s625_s2 + $0x30] sm:$0xff]  ;;  %v19_v8 = vld [vmem:[%s625_s2 + $0x28] sm:$0xff] }
  0x18   :  { %131 = vmatpush.msra.mxu1 %v43_v42  ;;  %109 = vmatpush.msra.mxu0 %v26_v44  ;;  %v70_v1 = vld [vmem:[%s624_s1 + $0x180] sm:$0xff]  ;;  %v21_v9 = vld [vmem:[%s625_s2 + $0x38] sm:$0xff]  ;;  %v593_v10 = vld [vmem:[%s626_s0 + $0x8] sm:$0xff] }
  0x19   :  { %177 = vmatpush.msra.mxu3 %v75_v43  ;;  %155 = vmatpush.msra.mxu2 %v58_v45  ;;  %v575_v4 = vld [vmem:[%s626_s0] sm:$0xff]  ;;  %s346_s0 = smov 1  }
  0x1a   :  { %132 = vmatpush.msra.mxu1 %v42_v46  ;;  %110 = vmatpush.msra.mxu0 %v25_v48  ;;  %v18_v6 = vld [vmem:[%s625_s2 + $0x20] sm:$0xff] }
  0x1b   :  { %178 = vmatpush.msra.mxu3 %v74_v47  ;;  %156 = vmatpush.msra.mxu2 %v57_v49 }
  0x1c   :  { %133 = vmatpush.msra.mxu1 %v41_v50  ;;  %111 = vmatpush.msra.mxu0 %v24_v52 }
  0x1d   :  { %179 = vmatpush.msra.mxu3 %v73_v51  ;;  %157 = vmatpush.msra.mxu2 %v56_v53 }
  0x1e   :  { %134 = vmatpush.msra.mxu1 %v40_v54  ;;  %112 = vmatpush.msra.mxu0 %v23_v56 }
  0x1f   :  { %180 = vmatpush.msra.mxu3 %v72_v55  ;;  %158 = vmatpush.msra.mxu2 %v55_v57 }
  0x20   :  { %135 = vmatpush.msra.mxu1 %v39_v58  ;;  %113 = vmatpush.msra.mxu0 %v22_v60 }
  0x21   :  { %181 = vmatpush.msra.mxu3 %v71_v59  ;;  %159 = vmatpush.msra.mxu2 %v54_v61 }
  0x22   :  { %114 = vmatmul.f32.vlgmr.msra.gmra.mxu0 %v14_v62  ;;  %160 = vmatmul.f32.vlgmr.msra.gmra.mxu2 %v16_v63 }
  0x23   :  { %136 = vmatpush.msra.mxu1 %v38_v0  ;;  %182 = vmatpush.msra.mxu3 %v70_v1 }
  0x24   :  { %137 = vmatmul.f32.vlgmr.msra.gmra.mxu1 %v15_v2  ;;  %183 = vmatmul.f32.vlgmr.msra.gmra.mxu3 %v17_v3 }
  0x25   :  { %327 = vset.pattern.permute.xlu0 %v344_v5  ;;  %328 = vset.pattern.permute.xlu2 %v345_v35 }
  0x26   :  { %90 = vperm.xlu0 %327, %v575_v4  }
  0x2a   :  { %117 = vmatmul.f32.gmra.mxu0 %v18_v6  ;;  %163 = vmatmul.f32.gmra.mxu2 %v20_v7  ;;  %v347_v7 = vmov 2  }
  0x2c   :  { %140 = vmatmul.f32.gmra.mxu1 %v19_v8  ;;  %186 = vmatmul.f32.gmra.mxu3 %v21_v9 }
  0x2e   :  { %95 = vperm.xlu0 %327, %v593_v10  }
  0x36   :  { %329 = vset.pattern.permute.xlu0 %v345_v35 }
  0x98   :  { %v91_v11 = vpop.permute.xlu0 %90 }
  0x9f   :  { %v115_v12 = vpop.f32.mrf.mxu0 }
  0xa0   :  { %v116_v13 = vadd.f32 %v115_v12, %v91_v11  ;;  %v96_v17 = vpop.permute.xlu0 %95 }
  0xa1   :  { %v138_v14 = vpop.f32.mrf.mxu1 }
  0xa2   :  { %v139_v15 = vadd.f32 %v138_v14, %v116_v13 }
  0xa5   :  { %v161_v16 = vpop.f32.mrf.mxu2 }
  0xa6   :  { %v162_v18 = vadd.f32 %v161_v16, %v139_v15 }
  0xa7   :  { %v118_v19 = vpop.f32.mrf.mxu0  ;;  %v184_v20 = vpop.f32.mrf.mxu3 }
  0xa8   :  { %v119_v21 = vadd.f32 %v118_v19, %v96_v17  ;;  %v596_v22 = vadd.f32 %v184_v20, %v162_v18 }
  0xa9   :  { %v141_v23 = vpop.f32.mrf.mxu1 }
  0xaa   :  { %v191_v24 = vsel %vm190_vm0, %v596_v22, 0.0  ;;  %v199_v25 = vmul.f32 %v596_v22, %v596_v22  ;;  %v142_v26 = vadd.f32 %v141_v23, %v119_v21 }
  0xab   :  { %192 = vadd.xlane.f32.xlu1 %v191_v24 }
  0xac   :  { %v201_v27 = vsel %vm190_vm0, %v199_v25, 0.0 }
  0xad   :  { %v164_v28 = vpop.f32.mrf.mxu2  ;;  %202 = vadd.xlane.f32.xlu2 %v201_v27 }
  0xae   :  { %v165_v29 = vadd.f32 %v164_v28, %v142_v26 }
  0xaf   :  { %v187_v30 = vpop.f32.mrf.mxu3 }
  0xb0   :  { %v603_v31 = vadd.f32 %v187_v30, %v165_v29 }
  0xb2   :  { %v194_v32 = vsel %vm190_vm0, %v603_v31, 0.0  ;;  %v200_v33 = vmul.f32 %v603_v31, %v603_v31 }
  0xb3   :  { %195 = vadd.xlane.f32.xlu1 %v194_v32 }
  0xb4   :  { %v204_v34 = vsel %vm190_vm0, %v200_v33, 0.0 }
  0xb5   :  { %205 = vadd.xlane.f32.xlu2 %v204_v34 }
 0x11e   :  { %v193_v36 = vpop.xlane.xlu1 %192 }
 0x11f   :  { %v197_v37 = vmul.f32 0.16666667, %v193_v36 }
 0x120   :  { %v203_v38 = vpop.xlane.xlu2 %202 }
 0x121   :  { %v209_v39 = vmul.f32 %v197_v37, %v197_v37  ;;  %v207_v40 = vmul.f32 0.16666667, %v203_v38 }
 0x123   :  { %v211_v41 = vsub.f32 %v207_v40, %v209_v39 }
 0x125   :  { %v213_v42 = vmax.f32 %v211_v41, 0.0 }
 0x126   :  { %v196_v43 = vpop.xlane.xlu1 %195 }
 0x127   :  { %v215_v44 = vadd.f32 1e-05, %v213_v42  ;;  %v198_v45 = vmul.f32 0.16666667, %v196_v43 }
 0x128   :  { %v206_v46 = vpop.xlane.xlu2 %205 }
 0x129   :  { %332 = vrsqrt.f32 %v215_v44  ;;  %v210_v47 = vmul.f32 %v198_v45, %v198_v45  ;;  %v208_v48 = vmul.f32 0.16666667, %v206_v46  ;;  %vm223_vm2 = vweird.f32 %v215_v44 }
 0x12b   :  { %v212_v49 = vsub.f32 %v208_v48, %v210_v47 }
 0x12d   :  { %v214_v50 = vmax.f32 %v212_v49, 0.0 }
 0x12f   :  { %v333_v51 = vpop.eup %332  ;;  %v216_v52 = vadd.f32 1e-05, %v214_v50 }
 0x130   :  { %v218_v53 = vmul.f32 %v333_v51, %v215_v44  ;;  %vm224_vm1 = vweird.f32 %v333_v51 }
 0x131   :  { %334 = vrsqrt.f32 %v216_v52  ;;  %vm225_vm3 = vmor %vm223_vm2, %vm224_vm1  ;;  %vm233_vm5 = vweird.f32 %v216_v52 }
 0x132   :  { %v219_v54 = vmul.f32 %v333_v51, %v218_v53 }
 0x134   :  { %v220_v55 = vmul.f32 0.5, %v219_v54 }
 0x136   :  { %v221_v56 = vsub.f32 1.5, %v220_v55 }
 0x137   :  { %v335_v57 = vpop.eup %334 }
 0x138   :  { %v228_v58 = vmul.f32 %v335_v57, %v216_v52  ;;  %v222_v59 = vmul.f32 %v333_v51, %v221_v56  ;;  %vm234_vm4 = vweird.f32 %v335_v57 }
 0x139   :  { %vm235_vm6 = vmor %vm233_vm5, %vm234_vm4 }
 0x13a   :  { %v229_v60 = vmul.f32 %v335_v57, %v228_v58  ;;  %v226_v61 = vsel %vm225_vm3, %v333_v51, %v222_v59 }
 0x13b   :  { %v237_v62 = vmul.f32 %v226_v61, %v575_v4 }
 0x13c   :  { %v230_v63 = vmul.f32 0.5, %v229_v60 }
 0x13d   :  { %253 = vperm.xlu2 %328, %v237_v62   ;;  %v239_v0 = vmul.f32 %v237_v62, %v197_v37 }
 0x13e   :  { %v231_v1 = vsub.f32 1.5, %v230_v63 }
 0x13f   :  { %243 = vrot.lane.b32.xlu0 %v239_v0, %s346_s0 }
 0x140   :  { %v232_v2 = vmul.f32 %v335_v57, %v231_v1 }
 0x142   :  { %v236_v3 = vsel %vm235_vm6, %v335_v57, %v232_v2 }
 0x143   :  { %v238_v5 = vmul.f32 %v236_v3, %v593_v10 }
 0x145   :  { %v240_v6 = vmul.f32 %v238_v5, %v198_v45  ;;  %331 = vset.pattern.permute.xlu2 %v347_v7 }
 0x147   :  { %258 = vperm.xlu0 %329, %v238_v5   ;;  %245 = vrot.lane.b32.xlu1 %v240_v6, %s346_s0 }
 0x14f   :  { %330 = vset.pattern.permute.xlu0 %v347_v7 }
 0x197   :  { %v254_v13 = vpop.permute.xlu2 %253 }
 0x198   :  { %v261_v21 = vmul.f32 %v254_v13, %v596_v22 }
 0x1b1   :  { %v244_v8 = vpop.permute.xlu0 %243 }
 0x1b2   :  { %v249_v9 = vsub.f32 %v575_v4, %v244_v8 }
 0x1b4   :  { %265 = vperm.xlu0 %330, %v249_v9  }
 0x1b9   :  { %v246_v11 = vpop.permute.xlu1 %245  ;;  %v259_v14 = vpop.permute.xlu0 %258 }
 0x1ba   :  { %v250_v12 = vsub.f32 %v593_v10, %v246_v11  ;;  %v262_v15 = vmul.f32 %v259_v14, %v603_v31 }
 0x1bc   :  { %270 = vperm.xlu2 %331, %v250_v12  }
 0x216   :  { %v271_v16 = vpop.permute.xlu2 %270 }
 0x217   :  { %v274_v17 = vadd.f32 %v271_v16, %v262_v15 }
 0x219   :  { %v322_v18 = vmul.f32 -1.442695, %v274_v17 }
 0x21b   :  { %336 = vpow2.f32 %v322_v18 }
 0x221   :  { %v337_v19 = vpop.eup %336 }
 0x222   :  { %v282_v20 = vadd.f32 1.0, %v337_v19 }
 0x224   :  { %338 = vrcp.f32 %v282_v20  ;;  %v309_v27 = vand.u32 2147483648, %v282_v20  ;;  %v307_v29 = vand.u32 2147483647, %v282_v20  ;;  %vm303_vm8 = vweird.f32 %v282_v20 }
 0x226   :  { %v266_v23 = vpop.permute.xlu0 %265  ;;  %v310_v32 = vor.u32 1.1754944e-38, %v309_v27  ;;  %vm308_vm10 = vcmp.eq.f32.partialorder %v307_v29, 8.507059e+37 }
 0x227   :  { %v273_v4 = vadd.f32 %v266_v23, %v261_v21 }
 0x229   :  { %v321_v24 = vmul.f32 -1.442695, %v273_v4 }
 0x22a   :  { %v339_v25 = vpop.eup %338 }
 0x22b   :  { %v299_v26 = vmul.f32 %v339_v25, %v282_v20  ;;  %340 = vpow2.f32 %v321_v24  ;;  %vm304_vm7 = vweird.f32 %v339_v25 }
 0x22c   :  { %vm305_vm9 = vmor %vm303_vm8, %vm304_vm7 }
 0x22d   :  { %v300_v10 = vsub.f32 1.0, %v299_v26 }
 0x22f   :  { %v301_v28 = vmul.f32 %v339_v25, %v300_v10 }
 0x231   :  { %v341_v30 = vpop.eup %340  ;;  %v302_v31 = vadd.f32 %v339_v25, %v301_v28 }
 0x232   :  { %v281_v33 = vadd.f32 1.0, %v341_v30 }
 0x233   :  { %v306_v34 = vsel %vm305_vm9, %v339_v25, %v302_v31 }
 0x234   :  { %v311_v22 = vsel %vm308_vm10, %v310_v32, %v306_v34  ;;  %342 = vrcp.f32 %v281_v33  ;;  %v294_v39 = vand.u32 2147483648, %v281_v33  ;;  %v292_v41 = vand.u32 2147483647, %v281_v33 }
 0x235   :  { %v314_v35 = vmul.f32 %v311_v22, %v274_v17  ;;  %vm288_vm12 = vweird.f32 %v281_v33 }
 0x236   :  { %v295_v43 = vor.u32 1.1754944e-38, %v294_v39  ;;  %vm293_vm14 = vcmp.eq.f32.partialorder %v292_v41, 8.507059e+37 }
 0x237   :  { %316 = vst.msk [vmem:[%s627_s3 + $0x8] sm:$0xff] %vm190_vm0, %v314_v35 }
 0x23a   :  { %v343_v36 = vpop.eup %342 }
 0x23b   :  { %v284_v37 = vmul.f32 %v343_v36, %v281_v33  ;;  %vm289_vm11 = vweird.f32 %v343_v36 }
 0x23c   :  { %vm290_vm13 = vmor %vm288_vm12, %vm289_vm11 }
 0x23d   :  { %v285_v38 = vsub.f32 1.0, %v284_v37 }
 0x23f   :  { %v286_v40 = vmul.f32 %v343_v36, %v285_v38 }
 0x241   :  { %v287_v42 = vadd.f32 %v343_v36, %v286_v40 }
 0x243   :  { %v291_v44 = vsel %vm290_vm13, %v343_v36, %v287_v42 }
 0x244   :  { %v296_v45 = vsel %vm293_vm14, %v295_v43, %v291_v44 }
 0x245   :  { %v313_v46 = vmul.f32 %v296_v45, %v273_v4 }
 0x247   :  { %315 = vst.msk [vmem:[%s627_s3] sm:$0xff] %vm190_vm0, %v313_v46 }

</bundles_post_ra>
